<compile_context>
chip_gen: v7x
topology: tpu7x:2x2x1
jax: 0.10.0
libtpu: 0.0.40
codegen_flags: <defaults>
</compile_context>

<pallas_src>
import numpy as np
import jax
import jax.numpy as jnp
from jax import lax
from jax.experimental import pallas as pl
from jax.experimental.pallas import tpu as pltpu

BN_EPS = 1e-5

# NAS-Bench-201 style genotype: list of nodes, each node is a tuple of
# (op_name, input_node_index) edges.
GENOTYPE = (
    (('nor_conv_3x3', 0),),
    (('nor_conv_1x1', 0), ('avg_pool_3x3', 1)),
    (('skip_connect', 0), ('none', 1), ('nor_conv_3x3', 2)),
)


# -----------------------------------------------------------------------------
# Cell construction (mirrors the PyTorch InferCell.__init__ wiring)
# -----------------------------------------------------------------------------
def init_infer_cell(genotype, C_in, C_out, stride, key):
    assert C_in == C_out and stride == 1, "only the stride-1, C_in==C_out cell"
    layers, node_IX, node_IN = [], [], []
    for node_info in genotype:
        cur_index, cur_innod = [], []
        for op_name, op_in in node_info:
            cin = C_in if op_in == 0 else C_out
            if op_name in ('nor_conv_3x3', 'nor_conv_1x1'):
                k = 3 if op_name == 'nor_conv_3x3' else 1
                key, sub = jax.random.split(key)
                # PyTorch conv weight layout: (C_out, C_in, kH, kW)
                w_raw = jax.random.normal(sub, (C_out, cin, k, k), jnp.float32) * 0.1
                layers.append(('conv', dict(w_raw=w_raw, k=k)))
            elif op_name == 'avg_pool_3x3':
                assert cin == C_out  # POOLING preprocess path not needed
                layers.append(('avgpool', {}))
            elif op_name == 'skip_connect':
                assert cin == C_out  # Identity branch of skip_connect
                layers.append(('identity', {}))
            elif op_name == 'none':
                layers.append(('zero', {}))
            else:
                raise ValueError(op_name)
            cur_index.append(len(layers) - 1)
            cur_innod.append(op_in)
        node_IX.append(cur_index)
        node_IN.append(cur_innod)
    return layers, node_IX, node_IN


# -----------------------------------------------------------------------------
# Host-side weight preparation: fold the conv width taps into lane-dense
# matrices so each conv is a single wide MXU matmul inside the kernel.
# Lane convention everywhere: lane index l = w * C + c.
# -----------------------------------------------------------------------------
def _banded_conv_weight(w_raw, W):
    """(C_out, C_in, k, k) torch-layout weight -> dense lane-space matrix."""
    w = np.asarray(w_raw)
    C_out, C_in, KH, KW = w.shape
    if KH == 1:  # 1x1 conv, pad 0 -> block diagonal (W*C_in, W*C_out)
        m = np.zeros((W, C_in, W, C_out), np.float32)
        wt = w[:, :, 0, 0].T
        for ww in range(W):
            m[ww, :, ww, :] = wt
        return jnp.asarray(m.reshape(W * C_in, W * C_out))
    # 3x3 conv, stride 1, pad 1. Row (height) shifts are handled in-kernel via
    # three height-shifted slabs concatenated along lanes; width taps and the
    # width zero-padding are baked into a banded matrix per row shift.
    m = np.zeros((KH, W, C_in, W, C_out), np.float32)
    for di in range(KH):
        for dj in range(KW):
            for ww in range(W):
                wq = ww + dj - 1  # input width column feeding output column ww
                if 0 <= wq < W:
                    m[di, wq, :, ww, :] = w[:, :, di, dj].T
    return jnp.asarray(m.reshape(KH * W * C_in, W * C_out))


def _channel_group_matrix(W, C):
    """GG[l, l'] = 1 iff lanes l, l' hold the same channel (for BN stats)."""
    l = np.arange(W * C)
    return jnp.asarray((l[:, None] % C == l[None, :] % C).astype(np.float32))


def _pool_band_matrix(W, C):
    """0/1 banded matrix: width-window (radius 1) sum per channel, zero pad."""
    a = np.zeros((W, C, W, C), np.float32)
    for ww in range(W):
        for wq in range(max(0, ww - 1), min(W, ww + 2)):
            for c in range(C):
                a[wq, c, ww, c] = 1.0
    return jnp.asarray(a.reshape(W * C, W * C))


# -----------------------------------------------------------------------------
# The fused whole-cell kernel
# -----------------------------------------------------------------------------
def _make_cell_kernel(layers, node_IX, node_IN, w_slot, n_w, B, H, W, C):
    L = W * C          # lane width of the dense layout
    R = B * H          # rows of the dense layout
    n_samples = float(B * H * W)

    def bn(y, gg):
        # Training-mode BatchNorm2d, gamma=1, beta=0. Per-channel stats are
        # gathered/broadcast across the (w, c) lane packing with the 0/1
        # channel-group matrix on the MXU (lane-dense, no reshapes).
        inv_n = 1.0 / n_samples
        mean_l = jnp.sum(jnp.dot(y, gg, preferred_element_type=jnp.float32),
                         axis=0, keepdims=True) * inv_n
        d = y - mean_l
        var_l = jnp.sum(jnp.dot(d * d, gg, preferred_element_type=jnp.float32),
                        axis=0, keepdims=True) * inv_n
        return d * lax.rsqrt(var_l + BN_EPS)

    def kernel(*refs):
        x_ref, gg_ref, pool_ref = refs[0], refs[1], refs[2]
        w_refs = refs[3:3 + n_w]
        o_ref = refs[3 + n_w]
        pad_ref = refs[4 + n_w]          # VMEM scratch (B, H+2, W*C)

        x = x_ref[...]                   # (R, L) lane-dense activations
        gg = gg_ref[...]

        # Zero the height-padding rows once; interior rows are fully
        # overwritten before every use, so the border stays zero.
        pad_ref[...] = jnp.zeros_like(pad_ref)

        def conv3x3_bn(v_relu, w_ref):
            pad_ref[:, 1:H + 1, :] = v_relu.reshape(B, H, L)
            # row-shift "im2col": 3 height-shifted slabs, lane-concatenated
            patch = jnp.concatenate(
                [pad_ref[:, di:di + H, :].reshape(R, L) for di in range(3)],
                axis=-1)                                      # (R, 3*L)
            y = jnp.dot(patch, w_ref[...],
                        preferred_element_type=jnp.float32)   # single MXU dot
            return bn(y, gg)

        def conv1x1_bn(v_relu, w_ref):
            y = jnp.dot(v_relu, w_ref[...], preferred_element_type=jnp.float32)
            return bn(y, gg)

        def avg_pool(v):
            pad_ref[:, 1:H + 1, :] = v.reshape(B, H, L)
            s = (pad_ref[:, 0:H, :] + pad_ref[:, 1:H + 1, :]
                 + pad_ref[:, 2:H + 2, :])                    # height window
            hh = lax.broadcasted_iota(jnp.int32, (1, H, 1), 1)
            cnt_h = (3.0 - (hh == 0).astype(jnp.float32)
                     - (hh == H - 1).astype(jnp.float32))
            s = s * (1.0 / cnt_h)
            ws = jnp.dot(s.reshape(R, L), pool_ref[...],
                         preferred_element_type=jnp.float32)  # width window
            ll = lax.broadcasted_iota(jnp.int32, (1, L), 1)
            cnt_w = (3.0 - (ll < C).astype(jnp.float32)
                     - (ll >= (W - 1) * C).astype(jnp.float32))
            return ws * (1.0 / cnt_w)    # count_include_pad=False

        relu_cache = {}

        def get_relu(node_idx, val):
            if node_idx not in relu_cache:
                relu_cache[node_idx] = jnp.maximum(val, 0.0)
            return relu_cache[node_idx]

        nodes = [x]
        for idxs, innods in zip(node_IX, node_IN):
            acc = None
            for il, ii in zip(idxs, innods):
                kind, p = layers[il]
                inp = nodes[ii]
                if kind == 'conv':
                    vr = get_relu(ii, inp)
                    wr = w_refs[w_slot[il]]
                    out = conv3x3_bn(vr, wr) if p['k'] == 3 else conv1x1_bn(vr, wr)
                elif kind == 'avgpool':
                    out = avg_pool(inp)
                elif kind == 'identity':
                    out = inp
                else:
                    # 'none' (Zero, C_in==C_out, stride 1) is exactly zeros.
                    continue
                acc = out if acc is None else acc + out
            if acc is None:
                acc = jnp.zeros((R, L), jnp.float32)
            nodes.append(acc)
        o_ref[...] = nodes[-1]

    return kernel


def build_infer_cell(layers, node_IX, node_IN, B, H, W, C):
    L, R = W * C, B * H
    conv_layers = [il for il, (kind, _) in enumerate(layers) if kind == 'conv']
    w_slot = {il: s for s, il in enumerate(conv_layers)}
    weights = [_banded_conv_weight(layers[il][1]['w_raw'], W) for il in conv_layers]
    gg = _channel_group_matrix(W, C)
    pool_a = _pool_band_matrix(W, C)

    kernel = _make_cell_kernel(layers, node_IX, node_IN, w_slot, len(weights),
                               B, H, W, C)

    def full_spec(shape):
        nd = len(shape)
        return pl.BlockSpec(shape, lambda i, _n=nd: (0,) * _n)

    in_specs = ([full_spec((R, L)), full_spec((L, L)), full_spec((L, L))]
                + [full_spec(tuple(w.shape)) for w in weights])

    cell_call = pl.pallas_call(
        kernel,
        grid=(1,),
        in_specs=in_specs,
        out_specs=full_spec((R, L)),
        out_shape=jax.ShapeDtypeStruct((R, L), jnp.float32),
        scratch_shapes=[pltpu.VMEM((B, H + 2, L), jnp.float32)],
        compiler_params=pltpu.CompilerParams(
            dimension_semantics=("arbitrary",),
            vmem_limit_bytes=32 * 1024 * 1024),
    )

    @jax.jit
    def forward(x_nhwc):
        x_dense = x_nhwc.reshape(R, L)       # free reshape; lane-dense (w,c)
        out = cell_call(x_dense, gg, pool_a, *weights)
        return out.reshape(B, H, W, C)

    return forward


# -----------------------------------------------------------------------------
# Pure-JAX reference (for correctness check only)
# -----------------------------------------------------------------------------
def _ref_relu_conv_bn(x, w_raw, pad):
    xr = jnp.maximum(x, 0.0)
    w_hwio = jnp.transpose(w_raw, (2, 3, 1, 0))
    y = lax.conv_general_dilated(xr, w_hwio, (1, 1), [(pad, pad), (pad, pad)],
                                 dimension_numbers=('NHWC', 'HWIO', 'NHWC'))
    mean = jnp.mean(y, axis=(0, 1, 2), keepdims=True)
    var = jnp.mean(jnp.square(y - mean), axis=(0, 1, 2), keepdims=True)
    return (y - mean) * lax.rsqrt(var + BN_EPS)


def _ref_avg_pool(x):
    s = lax.reduce_window(x, 0.0, lax.add, (1, 3, 3, 1), (1, 1, 1, 1), 'SAME')
    c = lax.reduce_window(jnp.ones_like(x), 0.0, lax.add,
                          (1, 3, 3, 1), (1, 1, 1, 1), 'SAME')
    return s / c


def ref_forward(layers, node_IX, node_IN, x):
    nodes = [x]
    for idxs, innods in zip(node_IX, node_IN):
        outs = []
        for il, ii in zip(idxs, innods):
            kind, p = layers[il]
            inp = nodes[ii]
            if kind == 'conv':
                outs.append(_ref_relu_conv_bn(inp, p['w_raw'], (p['k'] - 1) // 2))
            elif kind == 'avgpool':
                outs.append(_ref_avg_pool(inp))
            elif kind == 'identity':
                outs.append(inp)
            else:
                outs.append(jnp.zeros_like(inp))
        nodes.append(sum(outs))
    return nodes[-1]


if __name__ == "__main__":
    key = jax.random.PRNGKey(0)
    B, C, H, W = 2, 8, 16, 16   # W * C == 128 -> exactly one full lane tile
    key, kx = jax.random.split(key)
    x_nchw = jax.random.normal(kx, (B, C, H, W), jnp.float32)   # PyTorch layout
    x = jnp.transpose(x_nchw, (0, 2, 3, 1))                     # NHWC for kernels

    layers, node_IX, node_IN = init_infer_cell(GENOTYPE, C, C, 1, key)
    forward = build_infer_cell(layers, node_IX, node_IN, B, H, W, C)

    out = jax.block_until_ready(forward(x))
    ref = jax.block_until_ready(ref_forward(layers, node_IX, node_IN, x))

    if not np.allclose(np.asarray(out), np.asarray(ref), rtol=1e-3, atol=1e-3):
        err = float(jnp.max(jnp.abs(out - ref)))
        raise AssertionError(f"Pallas InferCell mismatch, max abs err = {err}")

    print("KERNEL_OK")
</pallas_src>

<mosaic_0001>
module attributes {stable_mosaic.version = 11 : i64} {
  func.func @kernel(%arg0: i32, %arg1: memref<32x128xf32, #tpu.memory_space<vmem>>, %arg2: memref<128x128xf32, #tpu.memory_space<vmem>>, %arg3: memref<128x128xf32, #tpu.memory_space<vmem>>, %arg4: memref<384x128xf32, #tpu.memory_space<vmem>>, %arg5: memref<128x128xf32, #tpu.memory_space<vmem>>, %arg6: memref<384x128xf32, #tpu.memory_space<vmem>>, %arg7: memref<32x128xf32, #tpu.memory_space<vmem>>, %arg8: memref<2x18x128xf32, #tpu.memory_space<vmem>>) attributes {dimension_semantics = [#tpu.dimension_semantics<arbitrary>], iteration_bounds = array<i64: 1>, scalar_prefetch = 0 : i64, scratch_operands = 1 : i64, tpu.core_type = #tpu.core_type<tc>, window_params = [{pipeline_mode = #tpu.pipeline_mode<synchronous>, transform_indices = @transform_0, window_bounds = array<i64: 32, 128>}, {pipeline_mode = #tpu.pipeline_mode<synchronous>, transform_indices = @transform_1, window_bounds = array<i64: 128, 128>}, {pipeline_mode = #tpu.pipeline_mode<synchronous>, transform_indices = @transform_2, window_bounds = array<i64: 128, 128>}, {pipeline_mode = #tpu.pipeline_mode<synchronous>, transform_indices = @transform_3, window_bounds = array<i64: 384, 128>}, {pipeline_mode = #tpu.pipeline_mode<synchronous>, transform_indices = @transform_4, window_bounds = array<i64: 128, 128>}, {pipeline_mode = #tpu.pipeline_mode<synchronous>, transform_indices = @transform_5, window_bounds = array<i64: 384, 128>}, {pipeline_mode = #tpu.pipeline_mode<synchronous>, transform_indices = @transform_6, window_bounds = array<i64: 32, 128>}]} {
    %c0 = arith.constant 0 : index
    %c0_0 = arith.constant 0 : index
    %0 = vector.load %arg1[%c0, %c0_0] : memref<32x128xf32, #tpu.memory_space<vmem>>, vector<32x128xf32>
    %c0_1 = arith.constant 0 : index
    %c0_2 = arith.constant 0 : index
    %1 = vector.load %arg2[%c0_1, %c0_2] : memref<128x128xf32, #tpu.memory_space<vmem>>, vector<128x128xf32>
    %cst = arith.constant 0.000000e+00 : f32
    %2 = vector.broadcast %cst : f32 to vector<2x18x128xf32>
    %c0_3 = arith.constant 0 : index
    %c0_4 = arith.constant 0 : index
    %c0_5 = arith.constant 0 : index
    %3 = vector.load %arg8[%c0_3, %c0_4, %c0_5] : memref<2x18x128xf32, #tpu.memory_space<vmem>>, vector<2x18x128xf32>
    tpu.vector_store %arg8[%c0_3, %c0_4, %c0_5], %2 {strides = array<i32>} : memref<2x18x128xf32, #tpu.memory_space<vmem>>, vector<2x18x128xf32>,
    %cst_6 = arith.constant 0.000000e+00 : f32
    %4 = vector.broadcast %cst_6 : f32 to vector<32x128xf32>
    %5 = arith.maximumf %0, %4 : vector<32x128xf32>
    %6 = vector.shape_cast %5 : vector<32x128xf32> to vector<2x16x128xf32>
    %c0_7 = arith.constant 0 : index
    %c1 = arith.constant 1 : index
    %c0_8 = arith.constant 0 : index
    %7 = vector.load %arg8[%c0_7, %c1, %c0_8] : memref<2x18x128xf32, #tpu.memory_space<vmem>>, vector<2x16x128xf32>
    tpu.vector_store %arg8[%c0_7, %c1, %c0_8], %6 {strides = array<i32>} : memref<2x18x128xf32, #tpu.memory_space<vmem>>, vector<2x16x128xf32>,
    %c0_9 = arith.constant 0 : index
    %c0_10 = arith.constant 0 : index
    %c0_11 = arith.constant 0 : index
    %8 = vector.load %arg8[%c0_9, %c0_10, %c0_11] : memref<2x18x128xf32, #tpu.memory_space<vmem>>, vector<2x16x128xf32>
    %9 = vector.shape_cast %8 : vector<2x16x128xf32> to vector<32x128xf32>
    %c0_12 = arith.constant 0 : index
    %c1_13 = arith.constant 1 : index
    %c0_14 = arith.constant 0 : index
    %10 = vector.load %arg8[%c0_12, %c1_13, %c0_14] : memref<2x18x128xf32, #tpu.memory_space<vmem>>, vector<2x16x128xf32>
    %11 = vector.shape_cast %10 : vector<2x16x128xf32> to vector<32x128xf32>
    %c0_15 = arith.constant 0 : index
    %c2 = arith.constant 2 : index
    %c0_16 = arith.constant 0 : index
    %12 = vector.load %arg8[%c0_15, %c2, %c0_16] : memref<2x18x128xf32, #tpu.memory_space<vmem>>, vector<2x16x128xf32>
    %13 = vector.shape_cast %12 : vector<2x16x128xf32> to vector<32x128xf32>
    %14 = tpu.concatenate %9, %11, %13 in 1 : vector<32x128xf32>, vector<32x128xf32>, vector<32x128xf32> -> vector<32x384xf32>
    %c0_17 = arith.constant 0 : index
    %c0_18 = arith.constant 0 : index
    %15 = vector.load %arg4[%c0_17, %c0_18] : memref<384x128xf32, #tpu.memory_space<vmem>>, vector<384x128xf32>
    %cst_19 = arith.constant dense<0.000000e+00> : vector<32x128xf32>
    %16 = tpu.matmul %14, %15, %cst_19 {dimension_numbers = #tpu.dot_dimension_numbers<[1], [0], [0], [1], [0, 0, 1, 1], [], []>} : vector<32x384xf32>, vector<384x128xf32>, vector<32x128xf32> -> vector<32x128xf32>
    %cst_20 = arith.constant dense<0.000000e+00> : vector<32x128xf32>
    %17 = tpu.matmul %16, %1, %cst_20 {dimension_numbers = #tpu.dot_dimension_numbers<[1], [0], [0], [1], [0, 0, 1, 1], [], []>} : vector<32x128xf32>, vector<128x128xf32>, vector<32x128xf32> -> vector<32x128xf32>
    %cst_21 = arith.constant dense<0.000000e+00> : vector<128xf32>
    %18 = vector.multi_reduction <add>, %17, %cst_21 [0] : vector<32x128xf32> to vector<128xf32>
    %19 = vector.shape_cast %18 : vector<128xf32> to vector<1x128xf32>
    %cst_22 = arith.constant 0.001953125 : f32
    %20 = vector.broadcast %cst_22 : f32 to vector<1x128xf32>
    %21 = arith.mulf %19, %20 : vector<1x128xf32>
    %22 = vector.broadcast %21 : vector<1x128xf32> to vector<32x128xf32>
    %23 = arith.subf %16, %22 : vector<32x128xf32>
    %24 = arith.mulf %23, %23 : vector<32x128xf32>
    %cst_23 = arith.constant dense<0.000000e+00> : vector<32x128xf32>
    %25 = tpu.matmul %24, %1, %cst_23 {dimension_numbers = #tpu.dot_dimension_numbers<[1], [0], [0], [1], [0, 0, 1, 1], [], []>} : vector<32x128xf32>, vector<128x128xf32>, vector<32x128xf32> -> vector<32x128xf32>
    %cst_24 = arith.constant dense<0.000000e+00> : vector<128xf32>
    %26 = vector.multi_reduction <add>, %25, %cst_24 [0] : vector<32x128xf32> to vector<128xf32>
    %27 = vector.shape_cast %26 : vector<128xf32> to vector<1x128xf32>
    %cst_25 = arith.constant 0.001953125 : f32
    %28 = vector.broadcast %cst_25 : f32 to vector<1x128xf32>
    %29 = arith.mulf %27, %28 : vector<1x128xf32>
    %cst_26 = arith.constant 9.99999974E-6 : f32
    %30 = vector.broadcast %cst_26 : f32 to vector<1x128xf32>
    %31 = arith.addf %29, %30 : vector<1x128xf32>
    %32 = math.rsqrt %31 : vector<1x128xf32>
    %33 = vector.broadcast %32 : vector<1x128xf32> to vector<32x128xf32>
    %34 = arith.mulf %23, %33 : vector<32x128xf32>
    %c0_27 = arith.constant 0 : index
    %c0_28 = arith.constant 0 : index
    %35 = vector.load %arg5[%c0_27, %c0_28] : memref<128x128xf32, #tpu.memory_space<vmem>>, vector<128x128xf32>
    %cst_29 = arith.constant dense<0.000000e+00> : vector<32x128xf32>
    %36 = tpu.matmul %5, %35, %cst_29 {dimension_numbers = #tpu.dot_dimension_numbers<[1], [0], [0], [1], [0, 0, 1, 1], [], []>} : vector<32x128xf32>, vector<128x128xf32>, vector<32x128xf32> -> vector<32x128xf32>
    %cst_30 = arith.constant dense<0.000000e+00> : vector<32x128xf32>
    %37 = tpu.matmul %36, %1, %cst_30 {dimension_numbers = #tpu.dot_dimension_numbers<[1], [0], [0], [1], [0, 0, 1, 1], [], []>} : vector<32x128xf32>, vector<128x128xf32>, vector<32x128xf32> -> vector<32x128xf32>
    %cst_31 = arith.constant dense<0.000000e+00> : vector<128xf32>
    %38 = vector.multi_reduction <add>, %37, %cst_31 [0] : vector<32x128xf32> to vector<128xf32>
    %39 = vector.shape_cast %38 : vector<128xf32> to vector<1x128xf32>
    %cst_32 = arith.constant 0.001953125 : f32
    %40 = vector.broadcast %cst_32 : f32 to vector<1x128xf32>
    %41 = arith.mulf %39, %40 : vector<1x128xf32>
    %42 = vector.broadcast %41 : vector<1x128xf32> to vector<32x128xf32>
    %43 = arith.subf %36, %42 : vector<32x128xf32>
    %44 = arith.mulf %43, %43 : vector<32x128xf32>
    %cst_33 = arith.constant dense<0.000000e+00> : vector<32x128xf32>
    %45 = tpu.matmul %44, %1, %cst_33 {dimension_numbers = #tpu.dot_dimension_numbers<[1], [0], [0], [1], [0, 0, 1, 1], [], []>} : vector<32x128xf32>, vector<128x128xf32>, vector<32x128xf32> -> vector<32x128xf32>
    %cst_34 = arith.constant dense<0.000000e+00> : vector<128xf32>
    %46 = vector.multi_reduction <add>, %45, %cst_34 [0] : vector<32x128xf32> to vector<128xf32>
    %47 = vector.shape_cast %46 : vector<128xf32> to vector<1x128xf32>
    %cst_35 = arith.constant 0.001953125 : f32
    %48 = vector.broadcast %cst_35 : f32 to vector<1x128xf32>
    %49 = arith.mulf %47, %48 : vector<1x128xf32>
    %cst_36 = arith.constant 9.99999974E-6 : f32
    %50 = vector.broadcast %cst_36 : f32 to vector<1x128xf32>
    %51 = arith.addf %49, %50 : vector<1x128xf32>
    %52 = math.rsqrt %51 : vector<1x128xf32>
    %53 = vector.broadcast %52 : vector<1x128xf32> to vector<32x128xf32>
    %54 = arith.mulf %43, %53 : vector<32x128xf32>
    %55 = vector.shape_cast %34 : vector<32x128xf32> to vector<2x16x128xf32>
    %c0_37 = arith.constant 0 : index
    %c1_38 = arith.constant 1 : index
    %c0_39 = arith.constant 0 : index
    %56 = vector.load %arg8[%c0_37, %c1_38, %c0_39] : memref<2x18x128xf32, #tpu.memory_space<vmem>>, vector<2x16x128xf32>
    tpu.vector_store %arg8[%c0_37, %c1_38, %c0_39], %55 {strides = array<i32>} : memref<2x18x128xf32, #tpu.memory_space<vmem>>, vector<2x16x128xf32>,
    %c0_40 = arith.constant 0 : index
    %c0_41 = arith.constant 0 : index
    %c0_42 = arith.constant 0 : index
    %57 = vector.load %arg8[%c0_40, %c0_41, %c0_42] : memref<2x18x128xf32, #tpu.memory_space<vmem>>, vector<2x16x128xf32>
    %c0_43 = arith.constant 0 : index
    %c1_44 = arith.constant 1 : index
    %c0_45 = arith.constant 0 : index
    %58 = vector.load %arg8[%c0_43, %c1_44, %c0_45] : memref<2x18x128xf32, #tpu.memory_space<vmem>>, vector<2x16x128xf32>
    %59 = arith.addf %57, %58 : vector<2x16x128xf32>
    %c0_46 = arith.constant 0 : index
    %c2_47 = arith.constant 2 : index
    %c0_48 = arith.constant 0 : index
    %60 = vector.load %arg8[%c0_46, %c2_47, %c0_48] : memref<2x18x128xf32, #tpu.memory_space<vmem>>, vector<2x16x128xf32>
    %61 = arith.addf %59, %60 : vector<2x16x128xf32>
    %62 = tpu.iota {dimensions = array<i32: 1>} : vector<1x16x1xi32>
    %c0_i32 = arith.constant 0 : i32
    %63 = vector.broadcast %c0_i32 : i32 to vector<1x16x1xi32>
    %64 = arith.cmpi eq, %62, %63 : vector<1x16x1xi32>
    %65 = arith.extui %64 : vector<1x16x1xi1> to vector<1x16x1xi32>
    %66 = arith.sitofp %65 : vector<1x16x1xi32> to vector<1x16x1xf32>
    %cst_49 = arith.constant 3.000000e+00 : f32
    %67 = vector.broadcast %cst_49 : f32 to vector<1x16x1xf32>
    %68 = arith.subf %67, %66 : vector<1x16x1xf32>
    %c15_i32 = arith.constant 15 : i32
    %69 = vector.broadcast %c15_i32 : i32 to vector<1x16x1xi32>
    %70 = arith.cmpi eq, %62, %69 : vector<1x16x1xi32>
    %71 = arith.extui %70 : vector<1x16x1xi1> to vector<1x16x1xi32>
    %72 = arith.sitofp %71 : vector<1x16x1xi32> to vector<1x16x1xf32>
    %73 = arith.subf %68, %72 : vector<1x16x1xf32>
    %cst_50 = arith.constant 1.000000e+00 : f32
    %74 = vector.broadcast %cst_50 : f32 to vector<1x16x1xf32>
    %75 = arith.divf %74, %73 : vector<1x16x1xf32>
    %76 = vector.broadcast %75 : vector<1x16x1xf32> to vector<2x16x128xf32>
    %77 = arith.mulf %61, %76 : vector<2x16x128xf32>
    %78 = vector.shape_cast %77 : vector<2x16x128xf32> to vector<32x128xf32>
    %c0_51 = arith.constant 0 : index
    %c0_52 = arith.constant 0 : index
    %79 = vector.load %arg3[%c0_51, %c0_52] : memref<128x128xf32, #tpu.memory_space<vmem>>, vector<128x128xf32>
    %cst_53 = arith.constant dense<0.000000e+00> : vector<32x128xf32>
    %80 = tpu.matmul %78, %79, %cst_53 {dimension_numbers = #tpu.dot_dimension_numbers<[1], [0], [0], [1], [0, 0, 1, 1], [], []>} : vector<32x128xf32>, vector<128x128xf32>, vector<32x128xf32> -> vector<32x128xf32>
    %81 = tpu.iota {dimensions = array<i32: 1>} : vector<1x128xi32>
    %c8_i32 = arith.constant 8 : i32
    %82 = vector.broadcast %c8_i32 : i32 to vector<1x128xi32>
    %83 = arith.cmpi slt, %81, %82 : vector<1x128xi32>
    %84 = arith.extui %83 : vector<1x128xi1> to vector<1x128xi32>
    %85 = arith.sitofp %84 : vector<1x128xi32> to vector<1x128xf32>
    %cst_54 = arith.constant 3.000000e+00 : f32
    %86 = vector.broadcast %cst_54 : f32 to vector<1x128xf32>
    %87 = arith.subf %86, %85 : vector<1x128xf32>
    %c120_i32 = arith.constant 120 : i32
    %88 = vector.broadcast %c120_i32 : i32 to vector<1x128xi32>
    %89 = arith.cmpi sge, %81, %88 : vector<1x128xi32>
    %90 = arith.extui %89 : vector<1x128xi1> to vector<1x128xi32>
    %91 = arith.sitofp %90 : vector<1x128xi32> to vector<1x128xf32>
    %92 = arith.subf %87, %91 : vector<1x128xf32>
    %cst_55 = arith.constant 1.000000e+00 : f32
    %93 = vector.broadcast %cst_55 : f32 to vector<1x128xf32>
    %94 = arith.divf %93, %92 : vector<1x128xf32>
    %95 = vector.broadcast %94 : vector<1x128xf32> to vector<32x128xf32>
    %96 = arith.mulf %80, %95 : vector<32x128xf32>
    %97 = arith.addf %54, %96 : vector<32x128xf32>
    %cst_56 = arith.constant 0.000000e+00 : f32
    %98 = vector.broadcast %cst_56 : f32 to vector<32x128xf32>
    %99 = arith.maximumf %97, %98 : vector<32x128xf32>
    %100 = vector.shape_cast %99 : vector<32x128xf32> to vector<2x16x128xf32>
    %c0_57 = arith.constant 0 : index
    %c1_58 = arith.constant 1 : index
    %c0_59 = arith.constant 0 : index
    %101 = vector.load %arg8[%c0_57, %c1_58, %c0_59] : memref<2x18x128xf32, #tpu.memory_space<vmem>>, vector<2x16x128xf32>
    tpu.vector_store %arg8[%c0_57, %c1_58, %c0_59], %100 {strides = array<i32>} : memref<2x18x128xf32, #tpu.memory_space<vmem>>, vector<2x16x128xf32>,
    %c0_60 = arith.constant 0 : index
    %c0_61 = arith.constant 0 : index
    %c0_62 = arith.constant 0 : index
    %102 = vector.load %arg8[%c0_60, %c0_61, %c0_62] : memref<2x18x128xf32, #tpu.memory_space<vmem>>, vector<2x16x128xf32>
    %103 = vector.shape_cast %102 : vector<2x16x128xf32> to vector<32x128xf32>
    %c0_63 = arith.constant 0 : index
    %c1_64 = arith.constant 1 : index
    %c0_65 = arith.constant 0 : index
    %104 = vector.load %arg8[%c0_63, %c1_64, %c0_65] : memref<2x18x128xf32, #tpu.memory_space<vmem>>, vector<2x16x128xf32>
    %105 = vector.shape_cast %104 : vector<2x16x128xf32> to vector<32x128xf32>
    %c0_66 = arith.constant 0 : index
    %c2_67 = arith.constant 2 : index
    %c0_68 = arith.constant 0 : index
    %106 = vector.load %arg8[%c0_66, %c2_67, %c0_68] : memref<2x18x128xf32, #tpu.memory_space<vmem>>, vector<2x16x128xf32>
    %107 = vector.shape_cast %106 : vector<2x16x128xf32> to vector<32x128xf32>
    %108 = tpu.concatenate %103, %105, %107 in 1 : vector<32x128xf32>, vector<32x128xf32>, vector<32x128xf32> -> vector<32x384xf32>
    %c0_69 = arith.constant 0 : index
    %c0_70 = arith.constant 0 : index
    %109 = vector.load %arg6[%c0_69, %c0_70] : memref<384x128xf32, #tpu.memory_space<vmem>>, vector<384x128xf32>
    %cst_71 = arith.constant dense<0.000000e+00> : vector<32x128xf32>
    %110 = tpu.matmul %108, %109, %cst_71 {dimension_numbers = #tpu.dot_dimension_numbers<[1], [0], [0], [1], [0, 0, 1, 1], [], []>} : vector<32x384xf32>, vector<384x128xf32>, vector<32x128xf32> -> vector<32x128xf32>
    %cst_72 = arith.constant dense<0.000000e+00> : vector<32x128xf32>
    %111 = tpu.matmul %110, %1, %cst_72 {dimension_numbers = #tpu.dot_dimension_numbers<[1], [0], [0], [1], [0, 0, 1, 1], [], []>} : vector<32x128xf32>, vector<128x128xf32>, vector<32x128xf32> -> vector<32x128xf32>
    %cst_73 = arith.constant dense<0.000000e+00> : vector<128xf32>
    %112 = vector.multi_reduction <add>, %111, %cst_73 [0] : vector<32x128xf32> to vector<128xf32>
    %113 = vector.shape_cast %112 : vector<128xf32> to vector<1x128xf32>
    %cst_74 = arith.constant 0.001953125 : f32
    %114 = vector.broadcast %cst_74 : f32 to vector<1x128xf32>
    %115 = arith.mulf %113, %114 : vector<1x128xf32>
    %116 = vector.broadcast %115 : vector<1x128xf32> to vector<32x128xf32>
    %117 = arith.subf %110, %116 : vector<32x128xf32>
    %118 = arith.mulf %117, %117 : vector<32x128xf32>
    %cst_75 = arith.constant dense<0.000000e+00> : vector<32x128xf32>
    %119 = tpu.matmul %118, %1, %cst_75 {dimension_numbers = #tpu.dot_dimension_numbers<[1], [0], [0], [1], [0, 0, 1, 1], [], []>} : vector<32x128xf32>, vector<128x128xf32>, vector<32x128xf32> -> vector<32x128xf32>
    %cst_76 = arith.constant dense<0.000000e+00> : vector<128xf32>
    %120 = vector.multi_reduction <add>, %119, %cst_76 [0] : vector<32x128xf32> to vector<128xf32>
    %121 = vector.shape_cast %120 : vector<128xf32> to vector<1x128xf32>
    %cst_77 = arith.constant 0.001953125 : f32
    %122 = vector.broadcast %cst_77 : f32 to vector<1x128xf32>
    %123 = arith.mulf %121, %122 : vector<1x128xf32>
    %cst_78 = arith.constant 9.99999974E-6 : f32
    %124 = vector.broadcast %cst_78 : f32 to vector<1x128xf32>
    %125 = arith.addf %123, %124 : vector<1x128xf32>
    %126 = math.rsqrt %125 : vector<1x128xf32>
    %127 = vector.broadcast %126 : vector<1x128xf32> to vector<32x128xf32>
    %128 = arith.mulf %117, %127 : vector<32x128xf32>
    %129 = arith.addf %0, %128 : vector<32x128xf32>
    %c0_79 = arith.constant 0 : index
    %c0_80 = arith.constant 0 : index
    %130 = vector.load %arg7[%c0_79, %c0_80] : memref<32x128xf32, #tpu.memory_space<vmem>>, vector<32x128xf32>
    tpu.vector_store %arg7[%c0_79, %c0_80], %129 {strides = array<i32>} : memref<32x128xf32, #tpu.memory_space<vmem>>, vector<32x128xf32>,
    return
  }
  func.func @transform_0(%arg0: i32) -> (i32, i32) {
    %c0_i32 = arith.constant 0 : i32
    %c0_i32_0 = arith.constant 0 : i32
    %c0_i32_1 = arith.constant 0 : i32
    return %c0_i32, %c0_i32_0 : i32, i32
  }
  func.func @transform_1(%arg0: i32) -> (i32, i32) {
    %c0_i32 = arith.constant 0 : i32
    %c0_i32_0 = arith.constant 0 : i32
    %c0_i32_1 = arith.constant 0 : i32
    return %c0_i32, %c0_i32_0 : i32, i32
  }
  func.func @transform_2(%arg0: i32) -> (i32, i32) {
    %c0_i32 = arith.constant 0 : i32
    %c0_i32_0 = arith.constant 0 : i32
    %c0_i32_1 = arith.constant 0 : i32
    return %c0_i32, %c0_i32_0 : i32, i32
  }
  func.func @transform_3(%arg0: i32) -> (i32, i32) {
    %c0_i32 = arith.constant 0 : i32
    %c0_i32_0 = arith.constant 0 : i32
    %c0_i32_1 = arith.constant 0 : i32
    return %c0_i32, %c0_i32_0 : i32, i32
  }
  func.func @transform_4(%arg0: i32) -> (i32, i32) {
    %c0_i32 = arith.constant 0 : i32
    %c0_i32_0 = arith.constant 0 : i32
    %c0_i32_1 = arith.constant 0 : i32
    return %c0_i32, %c0_i32_0 : i32, i32
  }
  func.func @transform_5(%arg0: i32) -> (i32, i32) {
    %c0_i32 = arith.constant 0 : i32
    %c0_i32_0 = arith.constant 0 : i32
    %c0_i32_1 = arith.constant 0 : i32
    return %c0_i32, %c0_i32_0 : i32, i32
  }
  func.func @transform_6(%arg0: i32) -> (i32, i32) {
    %c0_i32 = arith.constant 0 : i32
    %c0_i32_0 = arith.constant 0 : i32
    %c0_i32_1 = arith.constant 0 : i32
    return %c0_i32, %c0_i32_0 : i32, i32
  }
}

</mosaic_0001>

<bundles_post_ra>
// kernel: forward.1
= control target key start
LH: loop header
LB: loop body
LE: loop exit
PB: predicated region body
PF: predicated region fallthrough
CT: control target
= control target key end

     0   :  { %11 = vsyncpa [#allocation4], 0  ;;  %s2537_s21 = smov [#allocation3]   ;;  %s3224_s0 = inlined_call_operand.vmem [shape: f32[32,128], index: 0, kind: input, shape index: {}]   ;;  %s3225_s1 = inlined_call_operand.hbm [shape: f32[128,128], index: 1, kind: input, shape index: {}]   ;;  %s3226_s2 = inlined_call_operand.vmem [shape: f32[128,128], index: 2, kind: input, shape index: {}]   ;;  %s3227_s3 = inlined_call_operand.vmem [shape: f32[384,128], index: 3, kind: input, shape index: {}]   ;;  %s3228_s4 = inlined_call_operand.vmem [shape: f32[128,128], index: 4, kind: input, shape index: {}]   ;;  %s3229_s5 = inlined_call_operand.vmem [shape: f32[384,128], index: 5, kind: input, shape index: {}]   ;;  %s3230_s6 = inlined_call_operand.vmem [shape: f32[32,128], index: 6, kind: output, shape index: {}]  }
   0x1   :  { %s19_s22 = sshll.u32 %s2537_s21, 4  ;;  %s2513_s25 = scalar_lea.hbm %s3225_s1, 2048  ;;  %s20_s22 = int_to_ptr.vmem [resolvable:$true] %s19_s22 }
   0x2   :  { %p2514_p0 = scmp.ne.s32.totalorder %s3225_s1, %s2513_s25  ;;  %p2517_p1 = scmp.lt.u32.totalorder %s2513_s25, %s3225_s1 }
   0x4   :  { %p2519_p2 = pnand %p2517_p1, %p2514_p0 }
   0x6   :  { %2522 = shalt.err (!%p2519_p2)
}
   0x7   :  { %s2523_s30 = scalar_lea.vmem %s20_s22, 2048  ;;  %p2528_p4 = scmp.lt.s32.totalorder %s20_s22, %s20_s22 }
   0x8   :  { %p2524_p3 = scmp.ne.s32.totalorder %s20_s22, %s2523_s30  ;;  %p2529_p5 = scmp.lt.s32.totalorder %s2523_s30, %s2523_s30 }
   0xa   :  { %p2530_p6 = por %p2529_p5, %p2528_p4 }
   0xc   :  { %p2531_p7 = pnand %p2530_p6, %p2524_p3 }
   0xe   :  { %2534 = shalt.err (!%p2531_p7)
}
   0xf   :  { %s2538_s7 = smov 128   ;;  %s2539_s8 = smov 8  }
  0x10   :  { %25 = dma.hbm_to_vmem [thread:$0]  %s3225_s1, 2048, %s20_s22, [#allocation4], %s2538_s7, %s2538_s7, %s2539_s8  }
  0x11   :  { %2535 = dma.done.wait [#allocation4], 2048  }
  0x12   :  { %2536 = vsyncadd [#allocation4], 4294965248  ;;  %v2540_v0 = vmov 0.0   ;;  %v99_v1 = vld [vmem:[%s3227_s3 + $0x80] sm:$0xff]  ;;  %v100_v2 = vld [vmem:[%s3227_s3 + $0x88] sm:$0xff] }
  0x13   :  { %57 = vst [vmem:[#allocation2] sm:$0xff] %v2540_v0  ;;  %58 = vst [vmem:[#allocation2 + $0x8] sm:$0xff] %v2540_v0  ;;  %v83_v3 = vld [vmem:[%s3227_s3] sm:$0xff]  ;;  %v2109_v4 = vpack.c.bf16 %v100_v2, %v99_v1  ;;  %v84_v5 = vld [vmem:[%s3227_s3 + $0x8] sm:$0xff] }
  0x14   :  { %59 = vst [vmem:[#allocation2 + $0x10] sm:$0x3] %v2540_v0  ;;  %60 = vst [vmem:[#allocation2 + $0x18] sm:$0xff] %v2540_v0  ;;  %v115_v6 = vld [vmem:[%s3227_s3 + $0x100] sm:$0xff]  ;;  %v116_v7 = vld [vmem:[%s3227_s3 + $0x108] sm:$0xff]  ;;  %v2111_v8 = vpack.c.bf16 %v84_v5, %v83_v3 }
  0x15   :  { %61 = vst [vmem:[#allocation2 + $0x20] sm:$0xff] %v2540_v0  ;;  %62 = vst [vmem:[#allocation2 + $0x28] sm:$0x3] %v2540_v0  ;;  %v2141_v9 = vpack.c.bf16 %v116_v7, %v115_v6  ;;  %v101_v10 = vld [vmem:[%s3227_s3 + $0x90] sm:$0xff]  ;;  %v102_v11 = vld [vmem:[%s3227_s3 + $0x98] sm:$0xff]  ;;  %2110 = vmatprep.subr.bf16.mxu0 %v2109_v4 }
  0x16   :  { %v85_v12 = vld [vmem:[%s3227_s3 + $0x10] sm:$0xff]  ;;  %v2113_v13 = vpack.c.bf16 %v102_v11, %v101_v10  ;;  %v86_v14 = vld [vmem:[%s3227_s3 + $0x18] sm:$0xff]  ;;  %2112 = vmatpush3.bf16.msra.mxu0 %v2111_v8  ;;  %v103_v19 = vld [vmem:[%s3227_s3 + $0xa0] sm:$0xff] }
  0x17   :  { %v117_v15 = vld [vmem:[%s3227_s3 + $0x110] sm:$0xff]  ;;  %v118_v16 = vld [vmem:[%s3227_s3 + $0x118] sm:$0xff]  ;;  %2142 = vmatprep.subr.bf16.mxu1 %v2141_v9  ;;  %v2115_v17 = vpack.c.bf16 %v86_v14, %v85_v12  ;;  %v104_v20 = vld [vmem:[%s3227_s3 + $0xa8] sm:$0xff] }
  0x18   :  { %v2145_v18 = vpack.c.bf16 %v118_v16, %v117_v15  ;;  %v87_v21 = vld [vmem:[%s3227_s3 + $0x20] sm:$0xff]  ;;  %2144 = vmatpush3.bf16.msra.mxu1 %v2141_v9  ;;  %2114 = vmatprep.subr.bf16.mxu0 %v2113_v13  ;;  %v2117_v22 = vpack.c.bf16 %v104_v20, %v103_v19  ;;  %v88_v23 = vld [vmem:[%s3227_s3 + $0x28] sm:$0xff]  ;;  %v105_v27 = vld [vmem:[%s3227_s3 + $0xb0] sm:$0xff] }
  0x19   :  { %v119_v24 = vld [vmem:[%s3227_s3 + $0x120] sm:$0xff]  ;;  %v120_v25 = vld [vmem:[%s3227_s3 + $0x128] sm:$0xff]  ;;  %v106_v28 = vld [vmem:[%s3227_s3 + $0xb8] sm:$0xff]  ;;  %v2119_v31 = vpack.c.bf16 %v88_v23, %v87_v21 }
  0x1a   :  { %2146 = vmatprep.subr.bf16.mxu1 %v2145_v18  ;;  %v2149_v26 = vpack.c.bf16 %v120_v25, %v119_v24  ;;  %v121_v29 = vld [vmem:[%s3227_s3 + $0x130] sm:$0xff]  ;;  %v122_v30 = vld [vmem:[%s3227_s3 + $0x138] sm:$0xff]  ;;  %2116 = vmatpush3.bf16.msra.mxu0 %v2115_v17  ;;  %v2121_v32 = vpack.c.bf16 %v106_v28, %v105_v27  ;;  %v107_v36 = vld [vmem:[%s3227_s3 + $0xc0] sm:$0xff] }
  0x1b   :  { %2118 = vmatprep.subr.bf16.mxu0 %v2117_v22  ;;  %v89_v33 = vld [vmem:[%s3227_s3 + $0x30] sm:$0xff]  ;;  %v90_v34 = vld [vmem:[%s3227_s3 + $0x38] sm:$0xff]  ;;  %v2153_v35 = vpack.c.bf16 %v122_v30, %v121_v29  ;;  %v108_v37 = vld [vmem:[%s3227_s3 + $0xc8] sm:$0xff] }
  0x1c   :  { %2148 = vmatpush3.bf16.msra.mxu1 %v2145_v18  ;;  %v123_v38 = vld [vmem:[%s3227_s3 + $0x140] sm:$0xff]  ;;  %v124_v39 = vld [vmem:[%s3227_s3 + $0x148] sm:$0xff]  ;;  %v2123_v40 = vpack.c.bf16 %v90_v34, %v89_v33  ;;  %v2125_v41 = vpack.c.bf16 %v108_v37, %v107_v36  ;;  %v109_v45 = vld [vmem:[%s3227_s3 + $0xd0] sm:$0xff] }
  0x1d   :  { %2150 = vmatprep.subr.bf16.mxu1 %v2149_v26  ;;  %v91_v42 = vld [vmem:[%s3227_s3 + $0x40] sm:$0xff]  ;;  %v92_v43 = vld [vmem:[%s3227_s3 + $0x48] sm:$0xff]  ;;  %v2157_v44 = vpack.c.bf16 %v124_v39, %v123_v38  ;;  %v110_v46 = vld [vmem:[%s3227_s3 + $0xd8] sm:$0xff] }
  0x1e   :  { %2120 = vmatpush3.bf16.msra.mxu0 %v2119_v31  ;;  %v125_v47 = vld [vmem:[%s3227_s3 + $0x150] sm:$0xff]  ;;  %v126_v48 = vld [vmem:[%s3227_s3 + $0x158] sm:$0xff]  ;;  %v2127_v49 = vpack.c.bf16 %v92_v43, %v91_v42  ;;  %v37_v50 = vld [vmem:[%s3224_s0] sm:$0xff]  ;;  %v2129_v53 = vpack.c.bf16 %v110_v46, %v109_v45 }
  0x1f   :  { %2122 = vmatprep.subr.bf16.mxu0 %v2121_v32  ;;  %v38_v51 = vld [vmem:[%s3224_s0 + $0x8] sm:$0xff]  ;;  %v39_v52 = vld [vmem:[%s3224_s0 + $0x10] sm:$0xff]  ;;  %v94_v55 = vld [vmem:[%s3227_s3 + $0x58] sm:$0xff]  ;;  %v2711_v56 = vmax.f32 %v37_v50, 0.0  ;;  %v2161_v60 = vpack.c.bf16 %v126_v48, %v125_v47 }
  0x20   :  { %2152 = vmatpush3.bf16.msra.mxu1 %v2149_v26  ;;  %v93_v54 = vld [vmem:[%s3227_s3 + $0x50] sm:$0xff]  ;;  %v2713_v57 = vmax.f32 %v38_v51, 0.0  ;;  %v2715_v58 = vmax.f32 %v39_v52, 0.0  ;;  %v40_v59 = vld [vmem:[%s3224_s0 + $0x18] sm:$0xff]  ;;  %v111_v61 = vld [vmem:[%s3227_s3 + $0xe0] sm:$0xff] }
  0x21   :  { %2154 = vmatprep.subr.bf16.mxu1 %v2153_v35  ;;  %v112_v62 = vld [vmem:[%s3227_s3 + $0xe8] sm:$0xff]  ;;  %v2726_v63 = vmax.f32 %v40_v59, 0.0  ;;  %v127_v1 = vld [vmem:[%s3227_s3 + $0x160] sm:$0xff]  ;;  %67 = vst [vmem:[#allocation2 + $0x1] sm:$0xff] %v2711_v56  ;;  %195 = vmatprep.mubr.f32.mxu0 %v2711_v56  ;;  %v2131_v3 = vpack.c.bf16 %v94_v55, %v93_v54  ;;  %v113_v8 = vld [vmem:[%s3227_s3 + $0xf0] sm:$0xff] }
  0x22   :  { %2124 = vmatpush3.bf16.msra.mxu0 %v2123_v40  ;;  %v128_v2 = vld [vmem:[%s3227_s3 + $0x168] sm:$0xff]  ;;  %68 = vst [vmem:[#allocation2 + $0x9] sm:$0xff] %v2713_v57  ;;  %69 = vst [vmem:[#allocation2 + $0x19] sm:$0xff] %v2715_v58  ;;  %v2133_v4 = vpack.c.bf16 %v112_v62, %v111_v61  ;;  %v95_v5 = vld [vmem:[%s3227_s3 + $0x60] sm:$0xff] }
  0x23   :  { %2126 = vmatprep.subr.bf16.mxu0 %v2125_v41  ;;  %70 = vst [vmem:[#allocation2 + $0x21] sm:$0xff] %v2726_v63  ;;  %v96_v6 = vld [vmem:[%s3227_s3 + $0x68] sm:$0xff]  ;;  %v2165_v7 = vpack.c.bf16 %v128_v2, %v127_v1  ;;  %v114_v9 = vld [vmem:[%s3227_s3 + $0xf8] sm:$0xff]  ;;  %v129_v10 = vld [vmem:[%s3227_s3 + $0x170] sm:$0xff] }
  0x24   :  { %2156 = vmatpush3.bf16.msra.mxu1 %v2153_v35  ;;  %v130_v11 = vld [vmem:[%s3227_s3 + $0x178] sm:$0xff]  ;;  %v2135_v12 = vpack.c.bf16 %v96_v6, %v95_v5  ;;  %v2137_v13 = vpack.c.bf16 %v114_v9, %v113_v8  ;;  %v97_v14 = vld [vmem:[%s3227_s3 + $0x70] sm:$0xff]  ;;  %v43_v22 = vld [vmem:[#allocation3 + $0x10] sm:$0xff] }
  0x25   :  { %2158 = vmatprep.subr.bf16.mxu1 %v2157_v44  ;;  %v98_v15 = vld [vmem:[%s3227_s3 + $0x78] sm:$0xff]  ;;  %v2169_v16 = vpack.c.bf16 %v130_v11, %v129_v10  ;;  %v41_v18 = vld [vmem:[#allocation3] sm:$0xff]  ;;  %v44_v23 = vld [vmem:[#allocation3 + $0x18] sm:$0xff] }
  0x26   :  { %2128 = vmatpush3.bf16.msra.mxu0 %v2127_v49  ;;  %v42_v19 = vld [vmem:[#allocation3 + $0x8] sm:$0xff]  ;;  %v2139_v20 = vpack.c.bf16 %v98_v15, %v97_v14  ;;  %v2766_v27 = vpack.c.bf16 %v44_v23, %v43_v22  ;;  %v45_v28 = vld [vmem:[#allocation3 + $0x20] sm:$0xff]  ;;  %v47_v33 = vld [vmem:[#allocation3 + $0x30] sm:$0xff] }
  0x27   :  { %2130 = vmatprep.subr.bf16.mxu0 %v2129_v53  ;;  %v2763_v21 = vpack.c.bf16 %v42_v19, %v41_v18  ;;  %v46_v29 = vld [vmem:[#allocation3 + $0x28] sm:$0xff]  ;;  %v48_v34 = vld [vmem:[#allocation3 + $0x38] sm:$0xff]  ;;  %v49_v37 = vld [vmem:[#allocation3 + $0x40] sm:$0xff] }
  0x28   :  { %2160 = vmatpush3.bf16.msra.mxu1 %v2157_v44  ;;  %v71_v24 = vld [vmem:[#allocation2] sm:$0xff]  ;;  %v2772_v32 = vpack.c.bf16 %v46_v29, %v45_v28  ;;  %v2779_v36 = vpack.c.bf16 %v48_v34, %v47_v33  ;;  %v50_v38 = vld [vmem:[#allocation3 + $0x48] sm:$0xff]  ;;  %v52_v42 = vld [vmem:[#allocation3 + $0x58] sm:$0xff] }
  0x29   :  { %2162 = vmatprep.subr.bf16.mxu1 %v2161_v60  ;;  %v79_v17 = vld [vmem:[#allocation2 + $0x2] sm:$0xff]  ;;  %v80_v25 = vld [vmem:[#allocation2 + $0xa] sm:$0xff]  ;;  %v73_v35 = vld [vmem:[#allocation2 + $0x18] sm:$0xff]  ;;  %v2786_v40 = vpack.c.bf16 %v50_v38, %v49_v37 }
  0x2a   :  { %2132 = vmatpush3.bf16.msra.mxu0 %v2131_v3  ;;  %1761 = vmatprep.mubr.f32.mxu1 %v79_v17  ;;  %v81_v26 = vld [vmem:[#allocation2 + $0x1a] sm:$0xff]  ;;  %v72_v30 = vld [vmem:[#allocation2 + $0x8] sm:$0xff]  ;;  %v53_v44 = vld [vmem:[#allocation3 + $0x60] sm:$0xff] }
  0x2b   :  { %2134 = vmatprep.subr.bf16.mxu0 %v2133_v4  ;;  %v82_v31 = vld [vmem:[#allocation2 + $0x22] sm:$0xff]  ;;  %v54_v45 = vld [vmem:[#allocation3 + $0x68] sm:$0xff]  ;;  %v507_v3 = vld [vmem:[%s3228_s4 + $0x10] sm:$0xff] }
  0x2c   :  { %2164 = vmatpush3.bf16.msra.mxu1 %v2161_v60  ;;  %v74_v39 = vld [vmem:[#allocation2 + $0x20] sm:$0xff]  ;;  %v2802_v46 = vpack.c.bf16 %v54_v45, %v53_v44  ;;  %v56_v48 = vld [vmem:[#allocation3 + $0x78] sm:$0xff]  ;;  %v508_v4 = vld [vmem:[%s3228_s4 + $0x18] sm:$0xff] }
  0x2d   :  { %2166 = vmatprep.subr.bf16.mxu1 %v2165_v7  ;;  %v51_v41 = vld [vmem:[#allocation3 + $0x50] sm:$0xff]  ;;  %v506_v51 = vld [vmem:[%s3228_s4 + $0x8] sm:$0xff]  ;;  %v2241_v9 = vpack.c.bf16 %v508_v4, %v507_v3  ;;  %v511_v18 = vld [vmem:[%s3228_s4 + $0x30] sm:$0xff] }
  0x2e   :  { %2136 = vmatpush3.bf16.msra.mxu0 %v2135_v12  ;;  %v2792_v43 = vpack.c.bf16 %v52_v42, %v51_v41  ;;  %v55_v47 = vld [vmem:[#allocation3 + $0x70] sm:$0xff]  ;;  %v510_v12 = vld [vmem:[%s3228_s4 + $0x28] sm:$0xff]  ;;  %v512_v19 = vld [vmem:[%s3228_s4 + $0x38] sm:$0xff] }
  0x2f   :  { %2138 = vmatprep.subr.bf16.mxu0 %v2137_v13  ;;  %v2808_v49 = vpack.c.bf16 %v56_v48, %v55_v47  ;;  %v505_v50 = vld [vmem:[%s3228_s4] sm:$0xff]  ;;  %v2249_v23 = vpack.c.bf16 %v512_v19, %v511_v18  ;;  %v515_v28 = vld [vmem:[%s3228_s4 + $0x50] sm:$0xff]  ;;  %v516_v29 = vld [vmem:[%s3228_s4 + $0x58] sm:$0xff] }
  0x30   :  { %2168 = vmatpush3.bf16.msra.mxu1 %v2165_v7  ;;  %v2237_v52 = vpack.c.bf16 %v506_v51, %v505_v50  ;;  %v509_v11 = vld [vmem:[%s3228_s4 + $0x20] sm:$0xff]  ;;  %v519_v34 = vld [vmem:[%s3228_s4 + $0x70] sm:$0xff]  ;;  %v870_v19 = vld [vmem:[%s3226_s2 + $0x48] sm:$0xff] }
  0x31   :  { %2170 = vmatprep.subr.bf16.mxu1 %v2169_v16  ;;  %v869_v18 = vld [vmem:[%s3226_s2 + $0x40] sm:$0xff] }
  0x32   :  { %2140 = vmatpush3.bf16.msra.mxu0 %v2139_v20 }
  0x33   :  { %2174 = vmatprep.subr.bf16.mxu0 %v2763_v21 }
  0x34   :  { %2172 = vmatpush3.bf16.msra.mxu1 %v2169_v16  ;;  %v2245_v16 = vpack.c.bf16 %v510_v12, %v509_v11  ;;  %v865_v12 = vld [vmem:[%s3226_s2 + $0x20] sm:$0xff] }
  0x35   :  { %2206 = vmatprep.subr.bf16.mxu1 %v2763_v21  ;;  %196 = vmatmul.mubr.f32.vlgmr.msra.gmra.mrb[0].mxu0 %v71_v24  ;;  %v513_v24 = vld [vmem:[%s3228_s4 + $0x40] sm:$0xff] }
  0x36   :  { %200 = vmatprep.mubr.f32.mxu0 %v2713_v57  ;;  %2176 = vmatpush3.bf16.msra.mxu0 %v2763_v21 }
  0x37   :  { %1762 = vmatmul.mubr.f32.vlgmr.msra.gmra.mrb[0].mxu1 %v80_v25  ;;  %2178 = vmatprep.subr.bf16.mxu0 %v2766_v27  ;;  %v514_v25 = vld [vmem:[%s3228_s4 + $0x48] sm:$0xff] }
  0x38   :  { %1764 = vmatprep.mubr.f32.mxu1 %v81_v26  ;;  %2208 = vmatpush3.bf16.msra.mxu1 %v2763_v21  ;;  %v2253_v26 = vpack.c.bf16 %v514_v25, %v513_v24  ;;  %v873_v25 = vld [vmem:[%s3226_s2 + $0x60] sm:$0xff] }
  0x39   :  { %201 = vmatmul.mubr.f32.gmra.mrb[2].mxu0 %v72_v30  ;;  %2210 = vmatprep.subr.bf16.mxu1 %v2766_v27  ;;  %v2257_v30 = vpack.c.bf16 %v516_v29, %v515_v28  ;;  %v875_v29 = vld [vmem:[%s3226_s2 + $0x70] sm:$0xff] }
  0x3a   :  { %205 = vmatprep.mubr.f32.mxu0 %v2715_v58  ;;  %2180 = vmatpush3.bf16.msra.mxu0 %v2766_v27 }
  0x3b   :  { %1765 = vmatmul.mubr.f32.gmra.mrb[2].mxu1 %v82_v31  ;;  %2182 = vmatprep.subr.bf16.mxu0 %v2772_v32  ;;  %v517_v31 = vld [vmem:[%s3228_s4 + $0x60] sm:$0xff] }
  0x3c   :  { %2212 = vmatpush3.bf16.msra.mxu1 %v2766_v27 }
  0x3d   :  { %206 = vmatmul.mubr.f32.gmra.mrb[4].mxu0 %v73_v35  ;;  %2214 = vmatprep.subr.bf16.mxu1 %v2772_v32  ;;  %v520_v35 = vld [vmem:[%s3228_s4 + $0x78] sm:$0xff] }
  0x3e   :  { %210 = vmatprep.mubr.f32.mxu0 %v2726_v63  ;;  %2184 = vmatpush3.bf16.msra.mxu0 %v2772_v32  ;;  %v2265_v37 = vpack.c.bf16 %v520_v35, %v519_v34 }
  0x3f   :  { %2186 = vmatprep.subr.bf16.mxu0 %v2779_v36 }
  0x40   :  { %2216 = vmatpush3.bf16.msra.mxu1 %v2772_v32 }
  0x41   :  { %211 = vmatmul.mubr.f32.gmra.mrb[6].mxu0 %v74_v39  ;;  %2218 = vmatprep.subr.bf16.mxu1 %v2779_v36 }
  0x42   :  { %2188 = vmatpush3.bf16.msra.mxu0 %v2779_v36 }
  0x43   :  { %2190 = vmatprep.subr.bf16.mxu0 %v2786_v40 }
  0x44   :  { %2220 = vmatpush3.bf16.msra.mxu1 %v2779_v36 }
  0x45   :  { %2222 = vmatprep.subr.bf16.mxu1 %v2786_v40 }
  0x46   :  { %2192 = vmatpush3.bf16.msra.mxu0 %v2786_v40 }
  0x47   :  { %2194 = vmatprep.subr.bf16.mxu0 %v2792_v43 }
  0x48   :  { %2224 = vmatpush3.bf16.msra.mxu1 %v2786_v40 }
  0x49   :  { %2226 = vmatprep.subr.bf16.mxu1 %v2792_v43 }
  0x4a   :  { %2196 = vmatpush3.bf16.msra.mxu0 %v2792_v43 }
  0x4b   :  { %2198 = vmatprep.subr.bf16.mxu0 %v2802_v46 }
  0x4c   :  { %2228 = vmatpush3.bf16.msra.mxu1 %v2792_v43 }
  0x4d   :  { %2230 = vmatprep.subr.bf16.mxu1 %v2802_v46 }
  0x4e   :  { %2200 = vmatpush3.bf16.msra.mxu0 %v2802_v46 }
  0x4f   :  { %2202 = vmatprep.subr.bf16.mxu0 %v2808_v49 }
  0x50   :  { %2232 = vmatpush3.bf16.msra.mxu1 %v2802_v46 }
  0x51   :  { %2234 = vmatprep.subr.bf16.mxu1 %v2808_v49 }
  0x52   :  { %2204 = vmatpush3.bf16.msra.mxu0 %v2808_v49 }
  0x53   :  { %2238 = vmatprep.subr.bf16.mxu0 %v2237_v52 }
  0x54   :  { %2236 = vmatpush3.bf16.msra.mxu1 %v2808_v49 }
  0x55   :  { %2270 = vmatprep.subr.bf16.mxu1 %v2763_v21 }
 0x108   :  { %v1473_v53 = vpop.f32.mrb[0].mxu0 }
 0x109   :  { %v1474_v54 = vpop.f32.mrb[1].mxu0 }
 0x10a   :  { %v1763_v55 = vpop.f32.mrb[0].mxu1  ;;  %v1475_v59 = vadd.f32 %v1474_v54, %v1473_v53 }
 0x10b   :  { %v282_v60 = vpop.f32.mrb[1].mxu1 }
 0x10c   :  { %v2821_v61 = vadd.f32 %v1475_v59, %v282_v60  ;;  %v1476_v62 = vpop.f32.mrb[2].mxu0 }
 0x10d   :  { %v1477_v1 = vpop.f32.mrb[3].mxu0 }
 0x10e   :  { %v1766_v2 = vpop.f32.mrb[2].mxu1  ;;  %v1478_v5 = vadd.f32 %v1477_v1, %v1476_v62  ;;  %1799 = vmatprep.mubr.f32.mxu0 %v2821_v61 }
 0x10f   :  { %v292_v6 = vpop.f32.mrb[3].mxu1 }
 0x110   :  { %v2830_v7 = vadd.f32 %v1763_v55, %v1478_v5  ;;  %v1479_v8 = vpop.f32.mrb[4].mxu0 }
 0x111   :  { %v1480_v10 = vpop.f32.mrb[5].mxu0 }
 0x112   :  { %v1481_v13 = vadd.f32 %v1480_v10, %v1479_v8  ;;  %1800 = vmatmul.mubr.f32.vlgmr.msra.gmra.mrb[8].mxu0 %v2830_v7  ;;  %v864_v10 = vld [vmem:[%s3226_s2 + $0x18] sm:$0xff] }
 0x113   :  { %2240 = vmatpush3.bf16.msra.mxu0 %v2237_v52 }
 0x114   :  { %v2839_v14 = vadd.f32 %v1481_v13, %v292_v6  ;;  %v1482_v15 = vpop.f32.mrb[6].mxu0  ;;  %2242 = vmatprep.subr.bf16.mxu0 %v2241_v9  ;;  %v861_v6 = vld [vmem:[%s3226_s2] sm:$0xff]  ;;  %v866_v13 = vld [vmem:[%s3226_s2 + $0x28] sm:$0xff] }
 0x115   :  { %v1483_v17 = vpop.f32.mrb[7].mxu0 }
 0x116   :  { %v1484_v20 = vadd.f32 %v1483_v17, %v1482_v15  ;;  %1802 = vmatprep.mubr.f32.mxu0 %v2839_v14  ;;  %v867_v15 = vld [vmem:[%s3226_s2 + $0x30] sm:$0xff] }
 0x117   :  { %2244 = vmatpush3.bf16.msra.mxu0 %v2241_v9  ;;  %v863_v9 = vld [vmem:[%s3226_s2 + $0x10] sm:$0xff] }
 0x118   :  { %v2848_v22 = vadd.f32 %v1766_v2, %v1484_v20  ;;  %2246 = vmatprep.subr.bf16.mxu0 %v2245_v16  ;;  %v2337_v11 = vpack.c.bf16 %v864_v10, %v863_v9  ;;  %v2349_v20 = vpack.c.bf16 %v870_v19, %v869_v18 }
 0x11a   :  { %1803 = vmatmul.mubr.f32.gmra.mrb[10].mxu0 %v2848_v22 }
 0x11b   :  { %2248 = vmatpush3.bf16.msra.mxu0 %v2245_v16  ;;  %1875 = vmatprep.mubr.f32.mxu0 %v2711_v56  ;;  %v518_v56 = vld [vmem:[%s3228_s4 + $0x68] sm:$0xff]  ;;  %v868_v16 = vld [vmem:[%s3226_s2 + $0x38] sm:$0xff] }
 0x11c   :  { %2250 = vmatprep.subr.bf16.mxu0 %v2249_v23  ;;  %v2261_v33 = vpack.c.bf16 %v518_v56, %v517_v31  ;;  %v2345_v17 = vpack.c.bf16 %v868_v16, %v867_v15 }
 0x11f   :  { %2252 = vmatpush3.bf16.msra.mxu0 %v2249_v23  ;;  %v872_v23 = vld [vmem:[%s3226_s2 + $0x58] sm:$0xff] }
 0x120   :  { %2254 = vmatprep.subr.bf16.mxu0 %v2253_v26 }
 0x123   :  { %2256 = vmatpush3.bf16.msra.mxu0 %v2253_v26  ;;  %v874_v26 = vld [vmem:[%s3226_s2 + $0x68] sm:$0xff] }
 0x124   :  { %2258 = vmatprep.subr.bf16.mxu0 %v2257_v30  ;;  %v2357_v28 = vpack.c.bf16 %v874_v26, %v873_v25 }
 0x127   :  { %2260 = vmatpush3.bf16.msra.mxu0 %v2257_v30  ;;  %v876_v30 = vld [vmem:[%s3226_s2 + $0x78] sm:$0xff] }
 0x128   :  { %2262 = vmatprep.subr.bf16.mxu0 %v2261_v33  ;;  %v2361_v31 = vpack.c.bf16 %v876_v30, %v875_v29 }
 0x12b   :  { %2264 = vmatpush3.bf16.msra.mxu0 %v2261_v33 }
 0x12c   :  { %2266 = vmatprep.subr.bf16.mxu0 %v2265_v37 }
 0x12f   :  { %2268 = vmatpush3.bf16.msra.mxu0 %v2265_v37 }
 0x130   :  { %2302 = vmatprep.subr.bf16.mxu0 %v2763_v21 }
 0x132   :  { %1876 = vmatmul.mubr.f32.vlgmr.msra.gmra.mrb[12].mxu0 %v2713_v57 }
 0x133   :  { %1878 = vmatprep.mubr.f32.mxu0 %v2715_v58  ;;  %2304 = vmatpush3.bf16.msra.mxu0 %v2763_v21 }
 0x134   :  { %2306 = vmatprep.subr.bf16.mxu0 %v2766_v27 }
 0x136   :  { %1879 = vmatmul.mubr.f32.gmra.mrb[14].mxu0 %v2726_v63 }
 0x137   :  { %2308 = vmatpush3.bf16.msra.mxu0 %v2766_v27 }
 0x138   :  { %2310 = vmatprep.subr.bf16.mxu0 %v2772_v32 }
 0x13b   :  { %2312 = vmatpush3.bf16.msra.mxu0 %v2772_v32 }
 0x13c   :  { %2314 = vmatprep.subr.bf16.mxu0 %v2779_v36 }
 0x13f   :  { %2316 = vmatpush3.bf16.msra.mxu0 %v2779_v36 }
 0x140   :  { %2318 = vmatprep.subr.bf16.mxu0 %v2786_v40 }
 0x143   :  { %2320 = vmatpush3.bf16.msra.mxu0 %v2786_v40 }
 0x144   :  { %2322 = vmatprep.subr.bf16.mxu0 %v2792_v43 }
 0x147   :  { %2324 = vmatpush3.bf16.msra.mxu0 %v2792_v43 }
 0x148   :  { %2326 = vmatprep.subr.bf16.mxu0 %v2802_v46 }
 0x14b   :  { %2328 = vmatpush3.bf16.msra.mxu0 %v2802_v46 }
 0x14c   :  { %2330 = vmatprep.subr.bf16.mxu0 %v2808_v49 }
 0x14f   :  { %2332 = vmatpush3.bf16.msra.mxu0 %v2808_v49 }
 0x1e5   :  { %v1801_v57 = vpop.f32.mrb[8].mxu0 }
 0x1e6   :  { %v367_v58 = vpop.f32.mrb[9].mxu0 }
 0x1e7   :  { %v386_v63 = vadd.f32 %v1801_v57, %v367_v58 }
 0x1ed   :  { %v1804_v38 = vpop.f32.mrb[10].mxu0 }
 0x1ee   :  { %v377_v39 = vpop.f32.mrb[11].mxu0 }
 0x1ef   :  { %v387_v41 = vadd.f32 %v386_v63, %v377_v39 }
 0x1f1   :  { %v388_v42 = vadd.f32 %v1804_v38, %v387_v41 }
 0x1f3   :  { %v389_v44 = vrot.slane %v388_v42, 4 }
 0x1f5   :  { %v390_v45 = vadd.f32 %v389_v44, %v388_v42  ;;  %v834_v42 = vlaneseq }
 0x1f7   :  { %v391_v47 = vrot.slane %v390_v45, 2 }
 0x1f9   :  { %v392_v48 = vadd.f32 %v391_v47, %v390_v45  ;;  %v835_v47 = vshrl.u32 %v834_v42, 7 }
 0x1fb   :  { %v393_v50 = vrot.slane %v392_v48, 1  ;;  %vm837_vm0 = vcmp.eq.s32.totalorder %v835_v47, 0 }
 0x1fd   :  { %v394_v51 = vadd.f32 %v393_v50, %v392_v48 }
 0x1ff   :  { %v395_v52 = vmul.f32 0.001953125, %v394_v51  ;;  %v836_v51 = vadd.s32 8, %v835_v47 }
 0x201   :  { %v2896_v53 = vsub.f32 %v2821_v61, %v395_v52  ;;  %v2899_v54 = vsub.f32 %v2830_v7, %v395_v52  ;;  %v2902_v55 = vsub.f32 %v2839_v14, %v395_v52  ;;  %v2909_v62 = vsub.f32 %v2848_v22, %v395_v52  ;;  %v862_v7 = vld [vmem:[%s3226_s2 + $0x8] sm:$0xff]  ;;  %v871_v22 = vld [vmem:[%s3226_s2 + $0x50] sm:$0xff] }
 0x202   :  { %v2333_v8 = vpack.c.bf16 %v862_v7, %v861_v6  ;;  %v2341_v14 = vpack.c.bf16 %v866_v13, %v865_v12  ;;  %v2353_v24 = vpack.c.bf16 %v872_v23, %v871_v22  ;;  %vm846_vm1 = vcmp.eq.s32.totalorder %v836_v51, 15 }
 0x203   :  { %v400_v59 = vmul.f32 %v2896_v53, %v2896_v53  ;;  %v401_v60 = vmul.f32 %v2899_v54, %v2899_v54  ;;  %v402_v61 = vmul.f32 %v2902_v55, %v2902_v55  ;;  %v403_v3 = vmul.f32 %v2909_v62, %v2909_v62 }
 0x204   :  { %v1437_v52 = vsel %vm837_vm0, 1.0, %v2540_v0 }
 0x205   :  { %1837 = vmatprep.mubr.f32.mxu1 %v400_v59  ;;  %v2913_v1 = vpop.f32.mrb[12].mxu0  ;;  %v1438_v59 = vsel %vm846_vm1, 1.0, %v2540_v0 }
 0x206   :  { %1838 = vmatmul.mubr.f32.vlgmr.msra.gmra.mrb[4].mxu1 %v401_v60  ;;  %v2915_v2 = vpop.f32.mrb[13].mxu0  ;;  %v852_v7 = vsub.f32 3.0, %v1438_v59 }
 0x207   :  { %2272 = vmatpush3.bf16.msra.mxu1 %v2763_v21  ;;  %1840 = vmatprep.mubr.f32.mxu1 %v402_v61  ;;  %v843_v61 = vsub.f32 3.0, %v1437_v52 }
 0x208   :  { %2274 = vmatprep.subr.bf16.mxu1 %v2766_v27 }
 0x209   :  { %v2921_v4 = vpop.f32.mrb[14].mxu0 }
 0x20a   :  { %1841 = vmatmul.mubr.f32.gmra.mrb[6].mxu1 %v403_v3  ;;  %v2923_v5 = vpop.f32.mrb[15].mxu0 }
 0x20b   :  { %2276 = vmatpush3.bf16.msra.mxu1 %v2766_v27  ;;  %1913 = vmatprep.mubr.f32.mxu1 %v2915_v2 }
 0x20c   :  { %2278 = vmatprep.subr.bf16.mxu1 %v2772_v32 }
 0x20f   :  { %2280 = vmatpush3.bf16.msra.mxu1 %v2772_v32 }
 0x210   :  { %2282 = vmatprep.subr.bf16.mxu1 %v2779_v36 }
 0x213   :  { %2284 = vmatpush3.bf16.msra.mxu1 %v2779_v36 }
 0x214   :  { %2286 = vmatprep.subr.bf16.mxu1 %v2786_v40 }
 0x217   :  { %2288 = vmatpush3.bf16.msra.mxu1 %v2786_v40 }
 0x218   :  { %2290 = vmatprep.subr.bf16.mxu1 %v2792_v43 }
 0x21b   :  { %2292 = vmatpush3.bf16.msra.mxu1 %v2792_v43 }
 0x21c   :  { %2294 = vmatprep.subr.bf16.mxu1 %v2802_v46 }
 0x21f   :  { %2296 = vmatpush3.bf16.msra.mxu1 %v2802_v46 }
 0x220   :  { %2298 = vmatprep.subr.bf16.mxu1 %v2808_v49 }
 0x223   :  { %2300 = vmatpush3.bf16.msra.mxu1 %v2808_v49 }
 0x224   :  { %2334 = vmatprep.subr.bf16.mxu1 %v2333_v8 }
 0x226   :  { %1914 = vmatmul.mubr.f32.vlgmr.msra.gmra.mrb[8].mxu1 %v2913_v1 }
 0x227   :  { %1916 = vmatprep.mubr.f32.mxu1 %v2923_v5  ;;  %2336 = vmatpush3.bf16.msra.mxu1 %v2333_v8 }
 0x228   :  { %2338 = vmatprep.subr.bf16.mxu1 %v2337_v11 }
 0x22a   :  { %1917 = vmatmul.mubr.f32.gmra.mrb[10].mxu1 %v2921_v4 }
 0x22b   :  { %2340 = vmatpush3.bf16.msra.mxu1 %v2337_v11 }
 0x22c   :  { %2342 = vmatprep.subr.bf16.mxu1 %v2341_v14 }
 0x22f   :  { %2344 = vmatpush3.bf16.msra.mxu1 %v2341_v14 }
 0x230   :  { %2346 = vmatprep.subr.bf16.mxu1 %v2345_v17 }
 0x233   :  { %2348 = vmatpush3.bf16.msra.mxu1 %v2345_v17 }
 0x234   :  { %2350 = vmatprep.subr.bf16.mxu1 %v2349_v20 }
 0x237   :  { %2352 = vmatpush3.bf16.msra.mxu1 %v2349_v20 }
 0x238   :  { %2354 = vmatprep.subr.bf16.mxu1 %v2353_v24 }
 0x23b   :  { %2356 = vmatpush3.bf16.msra.mxu1 %v2353_v24 }
 0x23c   :  { %2358 = vmatprep.subr.bf16.mxu1 %v2357_v28 }
 0x23f   :  { %2360 = vmatpush3.bf16.msra.mxu1 %v2357_v28 }
 0x240   :  { %2362 = vmatprep.subr.bf16.mxu1 %v2361_v31 }
 0x243   :  { %2364 = vmatpush3.bf16.msra.mxu1 %v2361_v31 }
 0x2d9   :  { %v1839_v56 = vpop.f32.mrb[4].mxu1 }
 0x2da   :  { %v470_v33 = vpop.f32.mrb[5].mxu1 }
 0x2db   :  { %v489_v34 = vadd.f32 %v1839_v56, %v470_v33 }
 0x2dd   :  { %v1842_v35 = vpop.f32.mrb[6].mxu1 }
 0x2de   :  { %v480_v37 = vpop.f32.mrb[7].mxu1 }
 0x2df   :  { %v490_v57 = vadd.f32 %v489_v34, %v480_v37 }
 0x2e1   :  { %v491_v58 = vadd.f32 %v1842_v35, %v490_v57 }
 0x2e3   :  { %v492_v63 = vrot.slane %v491_v58, 4 }
 0x2e5   :  { %v493_v38 = vadd.f32 %v492_v63, %v491_v58 }
 0x2e7   :  { %v494_v39 = vrot.slane %v493_v38, 2 }
 0x2e9   :  { %v495_v41 = vadd.f32 %v494_v39, %v493_v38 }
 0x2eb   :  { %v496_v44 = vrot.slane %v495_v41, 1 }
 0x2ed   :  { %v497_v45 = vadd.f32 %v496_v44, %v495_v41 }
 0x2ef   :  { %v498_v48 = vmul.f32 0.001953125, %v497_v45 }
 0x2f1   :  { %v499_v50 = vadd.f32 1e-05, %v498_v48 }
 0x2f3   :  { %2497 = vrsqrt.f32 %v499_v50 }
 0x2f4   :  { %2499 = vrcp.f32 %v843_v61  ;;  %v1035_v61 = vld [vmem:[%s3229_s5 + $0x108] sm:$0xff] }
 0x2f5   :  { %2501 = vrcp.f32 %v852_v7  ;;  %v1003_v7 = vld [vmem:[%s3229_s5 + $0x8] sm:$0xff] }
 0x2f9   :  { %v1915_v60 = vpop.f32.mrb[8].mxu1 }
 0x2fa   :  { %v672_v3 = vpop.f32.mrb[9].mxu1 }
 0x2fb   :  { %v691_v6 = vadd.f32 %v1915_v60, %v672_v3  ;;  %v1034_v60 = vld [vmem:[%s3229_s5 + $0x100] sm:$0xff] }
 0x2fc   :  { %v1002_v3 = vld [vmem:[%s3229_s5] sm:$0xff] }
 0x2fd   :  { %v2498_v8 = vpop.eup %2497  ;;  %v1918_v9 = vpop.f32.mrb[10].mxu1 }
 0x2fe   :  { %v501_v10 = vmul.f32 %v2498_v8, %v2896_v53  ;;  %v502_v11 = vmul.f32 %v2498_v8, %v2899_v54  ;;  %v503_v12 = vmul.f32 %v2498_v8, %v2902_v55  ;;  %v504_v13 = vmul.f32 %v2498_v8, %v2909_v62  ;;  %v682_v14 = vpop.f32.mrb[11].mxu1  ;;  %v2500_v19 = vpop.eup %2499 }
 0x2ff   :  { %v692_v15 = vadd.f32 %v691_v6, %v682_v14  ;;  %v2502_v55 = vpop.eup %2501  ;;  %v2397_v6 = vpack.c.bf16 %v1035_v61, %v1034_v60  ;;  %v2367_v8 = vpack.c.bf16 %v1003_v7, %v1002_v3  ;;  %v1004_v14 = vld [vmem:[%s3229_s5 + $0x10] sm:$0xff]  ;;  %v1030_v61 = vld [vmem:[%s3229_s5 + $0xe0] sm:$0xff]  ;;  %v1031_v3 = vld [vmem:[%s3229_s5 + $0xe8] sm:$0xff] }
 0x300   :  { %810 = vst [vmem:[#allocation2 + $0x1] sm:$0xff] %v501_v10  ;;  %811 = vst [vmem:[#allocation2 + $0x9] sm:$0xff] %v502_v11  ;;  %v1046_v7 = vld [vmem:[%s3229_s5 + $0x160] sm:$0xff] }
 0x301   :  { %812 = vst [vmem:[#allocation2 + $0x19] sm:$0xff] %v503_v12  ;;  %813 = vst [vmem:[#allocation2 + $0x21] sm:$0xff] %v504_v13  ;;  %v693_v16 = vadd.f32 %v1918_v9, %v692_v15  ;;  %2398 = vmatprep.subr.bf16.mxu1 %v2397_v6  ;;  %v1020_v9 = vld [vmem:[%s3229_s5 + $0x90] sm:$0xff] }
 0x303   :  { %v694_v17 = vrot.slane %v693_v16, 4 }
 0x305   :  { %v695_v18 = vadd.f32 %v694_v17, %v693_v16  ;;  %v1005_v16 = vld [vmem:[%s3229_s5 + $0x18] sm:$0xff] }
 0x306   :  { %v2371_v17 = vpack.c.bf16 %v1005_v16, %v1004_v14  ;;  %v1048_v16 = vld [vmem:[%s3229_s5 + $0x170] sm:$0xff] }
 0x307   :  { %v696_v20 = vrot.slane %v695_v18, 2  ;;  %v814_v22 = vld [vmem:[#allocation2] sm:$0xff]  ;;  %v815_v53 = vld [vmem:[#allocation2 + $0x8] sm:$0xff] }
 0x308   :  { %v822_v23 = vadd.f32 %v814_v22, %v501_v10  ;;  %v823_v54 = vadd.f32 %v815_v53, %v502_v11  ;;  %v816_v24 = vld [vmem:[#allocation2 + $0x18] sm:$0xff]  ;;  %v826_v62 = vld [vmem:[#allocation2 + $0x2] sm:$0xff]  ;;  %v827_v26 = vld [vmem:[#allocation2 + $0xa] sm:$0xff] }
 0x309   :  { %v697_v25 = vadd.f32 %v696_v20, %v695_v18  ;;  %v824_v28 = vadd.f32 %v816_v24, %v503_v12  ;;  %v817_v29 = vld [vmem:[#allocation2 + $0x20] sm:$0xff]  ;;  %v1021_v10 = vld [vmem:[%s3229_s5 + $0x98] sm:$0xff]  ;;  %v1036_v12 = vld [vmem:[%s3229_s5 + $0x110] sm:$0xff] }
 0x30a   :  { %v830_v30 = vadd.f32 %v826_v62, %v822_v23  ;;  %v831_v31 = vadd.f32 %v827_v26, %v823_v54  ;;  %v828_v56 = vld [vmem:[#allocation2 + $0x1a] sm:$0xff]  ;;  %v825_v33 = vadd.f32 %v817_v29, %v504_v13  ;;  %v829_v37 = vld [vmem:[#allocation2 + $0x22] sm:$0xff]  ;;  %v2369_v11 = vpack.c.bf16 %v1021_v10, %v1020_v9 }
 0x30b   :  { %v698_v34 = vrot.slane %v697_v25, 1  ;;  %v832_v35 = vadd.f32 %v828_v56, %v824_v28  ;;  %v1037_v13 = vld [vmem:[%s3229_s5 + $0x118] sm:$0xff]  ;;  %v1022_v18 = vld [vmem:[%s3229_s5 + $0xa0] sm:$0xff]  ;;  %v1039_v53 = vld [vmem:[%s3229_s5 + $0x128] sm:$0xff] }
 0x30c   :  { %v857_v57 = vmul.f32 %v2500_v19, %v830_v30  ;;  %v858_v58 = vmul.f32 %v2502_v55, %v831_v31  ;;  %v833_v63 = vadd.f32 %v829_v37, %v825_v33  ;;  %v2401_v15 = vpack.c.bf16 %v1037_v13, %v1036_v12  ;;  %v1038_v22 = vld [vmem:[%s3229_s5 + $0x120] sm:$0xff]  ;;  %v1007_v24 = vld [vmem:[%s3229_s5 + $0x28] sm:$0xff]  ;;  %v1025_v62 = vld [vmem:[%s3229_s5 + $0xb8] sm:$0xff] }
 0x30d   :  { %v699_v38 = vadd.f32 %v698_v34, %v697_v25  ;;  %v859_v39 = vmul.f32 %v2500_v19, %v832_v35  ;;  %v1023_v19 = vld [vmem:[%s3229_s5 + $0xa8] sm:$0xff]  ;;  %v1006_v23 = vld [vmem:[%s3229_s5 + $0x20] sm:$0xff]  ;;  %v2405_v54 = vpack.c.bf16 %v1039_v53, %v1038_v22  ;;  %v1024_v25 = vld [vmem:[%s3229_s5 + $0xb0] sm:$0xff]  ;;  %v963_v53 = vand.u32 127, %v834_v42 }
 0x30e   :  { %1989 = vmatprep.mubr.f32.mxu1 %v857_v57  ;;  %v860_v44 = vmul.f32 %v2502_v55, %v833_v63  ;;  %v2373_v20 = vpack.c.bf16 %v1023_v19, %v1022_v18  ;;  %v2375_v55 = vpack.c.bf16 %v1007_v24, %v1006_v23  ;;  %v2377_v26 = vpack.c.bf16 %v1025_v62, %v1024_v25  ;;  %v1040_v28 = vld [vmem:[%s3229_s5 + $0x130] sm:$0xff]  ;;  %v1041_v29 = vld [vmem:[%s3229_s5 + $0x138] sm:$0xff]  ;;  %v1026_v34 = vld [vmem:[%s3229_s5 + $0xc0] sm:$0xff] }
 0x30f   :  { %v700_v41 = vmul.f32 0.001953125, %v699_v38  ;;  %1990 = vmatmul.mubr.f32.vlgmr.msra.gmra.mrb[12].mxu1 %v858_v58  ;;  %v1008_v30 = vld [vmem:[%s3229_s5 + $0x30] sm:$0xff]  ;;  %v2409_v31 = vpack.c.bf16 %v1041_v29, %v1040_v28  ;;  %v1009_v56 = vld [vmem:[%s3229_s5 + $0x38] sm:$0xff]  ;;  %v1027_v35 = vld [vmem:[%s3229_s5 + $0xc8] sm:$0xff]  ;;  %vm964_vm2 = vcmp.lt.s32.totalorder %v963_v53, 8  ;;  %vm968_vm3 = vcmp.ge.s32.totalorder %v963_v53, 120 }
 0x310   :  { %1992 = vmatprep.mubr.f32.mxu1 %v859_v39  ;;  %2400 = vmatpush3.bf16.msra.mxu1 %v2397_v6  ;;  %v2379_v33 = vpack.c.bf16 %v1009_v56, %v1008_v30  ;;  %v2381_v37 = vpack.c.bf16 %v1027_v35, %v1026_v34  ;;  %v1042_v57 = vld [vmem:[%s3229_s5 + $0x140] sm:$0xff]  ;;  %v1043_v58 = vld [vmem:[%s3229_s5 + $0x148] sm:$0xff]  ;;  %v2389_v6 = vpack.c.bf16 %v1031_v3, %v1030_v61  ;;  %v1032_v12 = vld [vmem:[%s3229_s5 + $0xf0] sm:$0xff]  ;;  %v1439_v23 = vsel %vm964_vm2, 1.0, %v2540_v0 }
 0x311   :  { %v2998_v45 = vsub.f32 %v2915_v2, %v700_v41  ;;  %v3001_v47 = vsub.f32 %v2913_v1, %v700_v41  ;;  %v3004_v48 = vsub.f32 %v2923_v5, %v700_v41  ;;  %v3007_v50 = vsub.f32 %v2921_v4, %v700_v41  ;;  %v1018_v4 = vld [vmem:[%s3229_s5 + $0x80] sm:$0xff]  ;;  %v1019_v5 = vld [vmem:[%s3229_s5 + $0x88] sm:$0xff]  ;;  %2402 = vmatprep.subr.bf16.mxu1 %v2401_v15  ;;  %v1033_v13 = vld [vmem:[%s3229_s5 + $0xf8] sm:$0xff] }
 0x312   :  { %v2365_v59 = vpack.c.bf16 %v1019_v5, %v1018_v4  ;;  %v1010_v63 = vld [vmem:[%s3229_s5 + $0x40] sm:$0xff]  ;;  %v2413_v38 = vpack.c.bf16 %v1043_v58, %v1042_v57  ;;  %v1011_v39 = vld [vmem:[%s3229_s5 + $0x48] sm:$0xff]  ;;  %v1012_v4 = vld [vmem:[%s3229_s5 + $0x50] sm:$0xff]  ;;  %v1440_v24 = vsel %vm968_vm3, 1.0, %v2540_v0 }
 0x313   :  { %1993 = vmatmul.mubr.f32.gmra.mrb[14].mxu1 %v860_v44  ;;  %v705_v51 = vmul.f32 %v2998_v45, %v2998_v45  ;;  %v706_v52 = vmul.f32 %v3001_v47, %v3001_v47  ;;  %v707_v2 = vmul.f32 %v3004_v48, %v3004_v48  ;;  %v708_v1 = vmul.f32 %v3007_v50, %v3007_v50  ;;  %v1028_v44 = vld [vmem:[%s3229_s5 + $0xd0] sm:$0xff]  ;;  %v1014_v9 = vld [vmem:[%s3229_s5 + $0x60] sm:$0xff] }
 0x314   :  { %2366 = vmatprep.subr.bf16.mxu0 %v2365_v59  ;;  %2404 = vmatpush3.bf16.msra.mxu1 %v2401_v15  ;;  %v2383_v41 = vpack.c.bf16 %v1011_v39, %v1010_v63  ;;  %v1013_v59 = vld [vmem:[%s3229_s5 + $0x58] sm:$0xff]  ;;  %v2393_v15 = vpack.c.bf16 %v1033_v13, %v1032_v12  ;;  %v1016_v18 = vld [vmem:[%s3229_s5 + $0x70] sm:$0xff] }
 0x315   :  { %1951 = vmatprep.mubr.f32.mxu0 %v705_v51  ;;  %2406 = vmatprep.subr.bf16.mxu1 %v2405_v54  ;;  %v1029_v51 = vld [vmem:[%s3229_s5 + $0xd8] sm:$0xff]  ;;  %v2387_v60 = vpack.c.bf16 %v1013_v59, %v1012_v4 }
 0x316   :  { %1952 = vmatmul.mubr.f32.vlgmr.msra.gmra.mrb[16].mxu0 %v706_v52  ;;  %v2385_v52 = vpack.c.bf16 %v1029_v51, %v1028_v44 }
 0x317   :  { %1954 = vmatprep.mubr.f32.mxu0 %v707_v2  ;;  %2368 = vmatpush3.bf16.msra.mxu0 %v2367_v8  ;;  %v1044_v2 = vld [vmem:[%s3229_s5 + $0x150] sm:$0xff]  ;;  %v1047_v8 = vld [vmem:[%s3229_s5 + $0x168] sm:$0xff] }
 0x318   :  { %2370 = vmatprep.subr.bf16.mxu0 %v2369_v11  ;;  %2408 = vmatpush3.bf16.msra.mxu1 %v2405_v54  ;;  %v2421_v10 = vpack.c.bf16 %v1047_v8, %v1046_v7  ;;  %v1015_v11 = vld [vmem:[%s3229_s5 + $0x68] sm:$0xff]  ;;  %v967_v54 = vsub.f32 3.0, %v1439_v23 }
 0x319   :  { %2410 = vmatprep.subr.bf16.mxu1 %v2409_v31  ;;  %v2391_v14 = vpack.c.bf16 %v1015_v11, %v1014_v9 }
 0x31a   :  { %1955 = vmatmul.mubr.f32.gmra.mrb[18].mxu0 %v708_v1  ;;  %v1045_v1 = vld [vmem:[%s3229_s5 + $0x158] sm:$0xff] }
 0x31b   :  { %2372 = vmatpush3.bf16.msra.mxu0 %v2371_v17  ;;  %v2417_v5 = vpack.c.bf16 %v1045_v1, %v1044_v2  ;;  %v1049_v17 = vld [vmem:[%s3229_s5 + $0x178] sm:$0xff] }
 0x31c   :  { %2374 = vmatprep.subr.bf16.mxu0 %v2373_v20  ;;  %2412 = vmatpush3.bf16.msra.mxu1 %v2409_v31  ;;  %v2425_v19 = vpack.c.bf16 %v1049_v17, %v1048_v16  ;;  %v1017_v20 = vld [vmem:[%s3229_s5 + $0x78] sm:$0xff] }
 0x31d   :  { %2414 = vmatprep.subr.bf16.mxu1 %v2413_v38  ;;  %v2395_v22 = vpack.c.bf16 %v1017_v20, %v1016_v18 }
 0x31f   :  { %2376 = vmatpush3.bf16.msra.mxu0 %v2375_v55  ;;  %v971_v55 = vsub.f32 %v967_v54, %v1440_v24 }
 0x320   :  { %2378 = vmatprep.subr.bf16.mxu0 %v2377_v26  ;;  %2416 = vmatpush3.bf16.msra.mxu1 %v2413_v38 }
 0x321   :  { %2418 = vmatprep.subr.bf16.mxu1 %v2417_v5  ;;  %2503 = vrcp.f32 %v971_v55 }
 0x323   :  { %2380 = vmatpush3.bf16.msra.mxu0 %v2379_v33 }
 0x324   :  { %2382 = vmatprep.subr.bf16.mxu0 %v2381_v37  ;;  %2420 = vmatpush3.bf16.msra.mxu1 %v2417_v5 }
 0x325   :  { %2422 = vmatprep.subr.bf16.mxu1 %v2421_v10 }
 0x327   :  { %2384 = vmatpush3.bf16.msra.mxu0 %v2383_v41 }
 0x328   :  { %2386 = vmatprep.subr.bf16.mxu0 %v2385_v52  ;;  %2424 = vmatpush3.bf16.msra.mxu1 %v2421_v10 }
 0x329   :  { %2426 = vmatprep.subr.bf16.mxu1 %v2425_v19 }
 0x32b   :  { %2388 = vmatpush3.bf16.msra.mxu0 %v2387_v60  ;;  %v2504_v25 = vpop.eup %2503 }
 0x32c   :  { %2390 = vmatprep.subr.bf16.mxu0 %v2389_v6  ;;  %2428 = vmatpush3.bf16.msra.mxu1 %v2425_v19 }
 0x32d   :  { %2462 = vmatprep.subr.bf16.mxu1 %v2763_v21 }
 0x32f   :  { %2392 = vmatpush3.bf16.msra.mxu0 %v2391_v14 }
 0x330   :  { %2394 = vmatprep.subr.bf16.mxu0 %v2393_v15 }
 0x333   :  { %2396 = vmatpush3.bf16.msra.mxu0 %v2395_v22 }
 0x334   :  { %2430 = vmatprep.subr.bf16.mxu0 %v2763_v21 }
 0x3e2   :  { %v1991_v62 = vpop.f32.mrb[12].mxu1 }
 0x3e3   :  { %v975_v26 = vmul.f32 %v2504_v25, %v1991_v62  ;;  %v943_v28 = vpop.f32.mrb[13].mxu1 }
 0x3e4   :  { %v974_v29 = vmul.f32 %v2504_v25, %v943_v28 }
 0x3e6   :  { %v1994_v30 = vpop.f32.mrb[14].mxu1 }
 0x3e7   :  { %v977_v31 = vmul.f32 %v2504_v25, %v1994_v30  ;;  %v953_v56 = vpop.f32.mrb[15].mxu1 }
 0x3e8   :  { %v976_v33 = vmul.f32 %v2504_v25, %v953_v56 }
 0x3e9   :  { %v1953_v34 = vpop.f32.mrb[16].mxu0 }
 0x3ea   :  { %v775_v42 = vpop.f32.mrb[17].mxu0 }
 0x3eb   :  { %v794_v35 = vadd.f32 %v1953_v34, %v775_v42 }
 0x3ed   :  { %v1956_v37 = vpop.f32.mrb[18].mxu0 }
 0x3ee   :  { %v785_v57 = vpop.f32.mrb[19].mxu0 }
 0x3ef   :  { %v795_v58 = vadd.f32 %v794_v35, %v785_v57 }
 0x3f1   :  { %v796_v63 = vadd.f32 %v1956_v37, %v795_v58 }
 0x3f3   :  { %v797_v38 = vrot.slane %v796_v63, 4 }
 0x3f5   :  { %v798_v0 = vadd.f32 %v797_v38, %v796_v63 }
 0x3f7   :  { %v799_v39 = vrot.slane %v798_v0, 2 }
 0x3f9   :  { %v800_v41 = vadd.f32 %v799_v39, %v798_v0 }
 0x3fb   :  { %v801_v44 = vrot.slane %v800_v41, 1 }
 0x3fd   :  { %v802_v51 = vadd.f32 %v801_v44, %v800_v41 }
 0x3ff   :  { %v803_v52 = vmul.f32 0.001953125, %v802_v51 }
 0x401   :  { %v804_v2 = vadd.f32 1e-05, %v803_v52 }
 0x403   :  { %2505 = vrsqrt.f32 %v804_v2 }
 0x40d   :  { %v2506_v1 = vpop.eup %2505 }
 0x40e   :  { %v806_v4 = vmul.f32 %v2506_v1, %v2998_v45  ;;  %v807_v5 = vmul.f32 %v2506_v1, %v3001_v47  ;;  %v808_v59 = vmul.f32 %v2506_v1, %v3004_v48  ;;  %v809_v60 = vmul.f32 %v2506_v1, %v3007_v50 }
 0x410   :  { %v978_v61 = vadd.f32 %v974_v29, %v806_v4  ;;  %v979_v3 = vadd.f32 %v975_v26, %v807_v5  ;;  %v980_v6 = vadd.f32 %v976_v33, %v808_v59  ;;  %v981_v7 = vadd.f32 %v977_v31, %v809_v60 }
 0x412   :  { %v982_v8 = vmax.f32 %v978_v61, 0.0  ;;  %v983_v9 = vmax.f32 %v979_v3, 0.0  ;;  %v984_v10 = vmax.f32 %v980_v6, 0.0  ;;  %v985_v11 = vmax.f32 %v981_v7, 0.0 }
 0x414   :  { %986 = vst [vmem:[#allocation2 + $0x1] sm:$0xff] %v982_v8  ;;  %987 = vst [vmem:[#allocation2 + $0x9] sm:$0xff] %v983_v9  ;;  %1114 = vmatprep.mubr.f32.mxu0 %v982_v8 }
 0x415   :  { %988 = vst [vmem:[#allocation2 + $0x19] sm:$0xff] %v984_v10  ;;  %989 = vst [vmem:[#allocation2 + $0x21] sm:$0xff] %v985_v11 }
 0x41b   :  { %v998_v45 = vld [vmem:[#allocation2 + $0x2] sm:$0xff]  ;;  %v999_v47 = vld [vmem:[#allocation2 + $0xa] sm:$0xff] }
 0x41c   :  { %v990_v12 = vld [vmem:[#allocation2] sm:$0xff]  ;;  %2027 = vmatprep.mubr.f32.mxu1 %v998_v45  ;;  %v991_v50 = vld [vmem:[#allocation2 + $0x8] sm:$0xff]  ;;  %v992_v14 = vld [vmem:[#allocation2 + $0x18] sm:$0xff] }
 0x41d   :  { %1115 = vmatmul.mubr.f32.vlgmr.msra.gmra.mrb[20].mxu0 %v990_v12  ;;  %2028 = vmatmul.mubr.f32.vlgmr.msra.gmra.mrb[16].mxu1 %v999_v47  ;;  %v1000_v48 = vld [vmem:[#allocation2 + $0x1a] sm:$0xff]  ;;  %v1001_v13 = vld [vmem:[#allocation2 + $0x22] sm:$0xff] }
 0x41e   :  { %1119 = vmatprep.mubr.f32.mxu0 %v983_v9  ;;  %2030 = vmatprep.mubr.f32.mxu1 %v1000_v48 }
 0x41f   :  { %2432 = vmatpush3.bf16.msra.mxu0 %v2763_v21  ;;  %2464 = vmatpush3.bf16.msra.mxu1 %v2763_v21  ;;  %v993_v21 = vld [vmem:[#allocation2 + $0x20] sm:$0xff] }
 0x420   :  { %2434 = vmatprep.subr.bf16.mxu0 %v2766_v27  ;;  %2466 = vmatprep.subr.bf16.mxu1 %v2766_v27 }
 0x421   :  { %1120 = vmatmul.mubr.f32.gmra.mrb[22].mxu0 %v991_v50  ;;  %2031 = vmatmul.mubr.f32.gmra.mrb[18].mxu1 %v1001_v13 }
 0x422   :  { %1124 = vmatprep.mubr.f32.mxu0 %v984_v10 }
 0x423   :  { %2436 = vmatpush3.bf16.msra.mxu0 %v2766_v27  ;;  %2468 = vmatpush3.bf16.msra.mxu1 %v2766_v27 }
 0x424   :  { %2438 = vmatprep.subr.bf16.mxu0 %v2772_v32  ;;  %2470 = vmatprep.subr.bf16.mxu1 %v2772_v32 }
 0x425   :  { %1125 = vmatmul.mubr.f32.gmra.mrb[24].mxu0 %v992_v14  ;;  %v2509_v14 = vld [vmem:[%s3224_s0] sm:$0xff] }
 0x426   :  { %1129 = vmatprep.mubr.f32.mxu0 %v985_v11 }
 0x427   :  { %2440 = vmatpush3.bf16.msra.mxu0 %v2772_v32  ;;  %2472 = vmatpush3.bf16.msra.mxu1 %v2772_v32 }
 0x428   :  { %2442 = vmatprep.subr.bf16.mxu0 %v2779_v36  ;;  %2474 = vmatprep.subr.bf16.mxu1 %v2779_v36 }
 0x429   :  { %1130 = vmatmul.mubr.f32.gmra.mrb[26].mxu0 %v993_v21 }
 0x42b   :  { %2444 = vmatpush3.bf16.msra.mxu0 %v2779_v36  ;;  %2476 = vmatpush3.bf16.msra.mxu1 %v2779_v36 }
 0x42c   :  { %2446 = vmatprep.subr.bf16.mxu0 %v2786_v40  ;;  %2478 = vmatprep.subr.bf16.mxu1 %v2786_v40 }
 0x42f   :  { %2448 = vmatpush3.bf16.msra.mxu0 %v2786_v40  ;;  %2480 = vmatpush3.bf16.msra.mxu1 %v2786_v40 }
 0x430   :  { %2450 = vmatprep.subr.bf16.mxu0 %v2792_v43  ;;  %2482 = vmatprep.subr.bf16.mxu1 %v2792_v43 }
 0x433   :  { %2452 = vmatpush3.bf16.msra.mxu0 %v2792_v43  ;;  %2484 = vmatpush3.bf16.msra.mxu1 %v2792_v43 }
 0x434   :  { %2454 = vmatprep.subr.bf16.mxu0 %v2802_v46  ;;  %2486 = vmatprep.subr.bf16.mxu1 %v2802_v46 }
 0x437   :  { %2456 = vmatpush3.bf16.msra.mxu0 %v2802_v46  ;;  %2488 = vmatpush3.bf16.msra.mxu1 %v2802_v46 }
 0x438   :  { %2458 = vmatprep.subr.bf16.mxu0 %v2808_v49  ;;  %2490 = vmatprep.subr.bf16.mxu1 %v2808_v49 }
 0x43b   :  { %2460 = vmatpush3.bf16.msra.mxu0 %v2808_v49  ;;  %2492 = vmatpush3.bf16.msra.mxu1 %v2808_v49 }
 0x4f0   :  { %v1657_v27 = vpop.f32.mrb[20].mxu0  ;;  %v2029_v32 = vpop.f32.mrb[16].mxu1 }
 0x4f1   :  { %v1658_v36 = vpop.f32.mrb[21].mxu0  ;;  %v1201_v15 = vpop.f32.mrb[17].mxu1 }
 0x4f2   :  { %v1659_v40 = vadd.f32 %v1658_v36, %v1657_v27  ;;  %v2510_v27 = vld [vmem:[%s3224_s0 + $0x8] sm:$0xff]  ;;  %v2511_v36 = vld [vmem:[%s3224_s0 + $0x10] sm:$0xff] }
 0x4f4   :  { %v1202_v43 = vadd.f32 %v1659_v40, %v1201_v15  ;;  %v1660_v16 = vpop.f32.mrb[22].mxu0  ;;  %v2032_v17 = vpop.f32.mrb[18].mxu1  ;;  %v2512_v15 = vld [vmem:[%s3224_s0 + $0x18] sm:$0xff] }
 0x4f5   :  { %v1661_v18 = vpop.f32.mrb[23].mxu0  ;;  %v1211_v20 = vpop.f32.mrb[19].mxu1 }
 0x4f6   :  { %v1662_v19 = vadd.f32 %v1661_v18, %v1660_v16  ;;  %2065 = vmatprep.mubr.f32.mxu0 %v1202_v43 }
 0x4f8   :  { %v1207_v22 = vadd.f32 %v2029_v32, %v1662_v19  ;;  %v1663_v46 = vpop.f32.mrb[24].mxu0 }
 0x4f9   :  { %v1664_v53 = vpop.f32.mrb[25].mxu0 }
 0x4fa   :  { %v1665_v23 = vadd.f32 %v1664_v53, %v1663_v46  ;;  %2066 = vmatmul.mubr.f32.vlgmr.msra.gmra.mrb[28].mxu0 %v1207_v22 }
 0x4fc   :  { %v1212_v54 = vadd.f32 %v1665_v23, %v1211_v20  ;;  %v1666_v24 = vpop.f32.mrb[26].mxu0 }
 0x4fd   :  { %v1667_v49 = vpop.f32.mrb[27].mxu0 }
 0x4fe   :  { %v1668_v55 = vadd.f32 %v1667_v49, %v1666_v24  ;;  %2068 = vmatprep.mubr.f32.mxu0 %v1212_v54 }
 0x500   :  { %v1217_v25 = vadd.f32 %v2032_v17, %v1668_v55 }
 0x502   :  { %2069 = vmatmul.mubr.f32.gmra.mrb[30].mxu0 %v1217_v25 }
 0x5cd   :  { %v2067_v62 = vpop.f32.mrb[28].mxu0 }
 0x5ce   :  { %v1286_v26 = vpop.f32.mrb[29].mxu0 }
 0x5cf   :  { %v1305_v28 = vadd.f32 %v2067_v62, %v1286_v26 }
 0x5d5   :  { %v2070_v29 = vpop.f32.mrb[30].mxu0 }
 0x5d6   :  { %v1296_v30 = vpop.f32.mrb[31].mxu0 }
 0x5d7   :  { %v1306_v31 = vadd.f32 %v1305_v28, %v1296_v30 }
 0x5d9   :  { %v1307_v56 = vadd.f32 %v2070_v29, %v1306_v31 }
 0x5db   :  { %v1308_v33 = vrot.slane %v1307_v56, 4 }
 0x5dd   :  { %v1309_v34 = vadd.f32 %v1308_v33, %v1307_v56 }
 0x5df   :  { %v1310_v42 = vrot.slane %v1309_v34, 2 }
 0x5e1   :  { %v1311_v35 = vadd.f32 %v1310_v42, %v1309_v34 }
 0x5e3   :  { %v1312_v37 = vrot.slane %v1311_v35, 1 }
 0x5e5   :  { %v1313_v57 = vadd.f32 %v1312_v37, %v1311_v35 }
 0x5e7   :  { %v1314_v58 = vmul.f32 0.001953125, %v1313_v57 }
 0x5e9   :  { %v1315_v63 = vsub.f32 %v1202_v43, %v1314_v58  ;;  %v1316_v38 = vsub.f32 %v1207_v22, %v1314_v58  ;;  %v1317_v0 = vsub.f32 %v1212_v54, %v1314_v58  ;;  %v1318_v44 = vsub.f32 %v1217_v25, %v1314_v58 }
 0x5eb   :  { %v1319_v39 = vmul.f32 %v1315_v63, %v1315_v63  ;;  %v1320_v41 = vmul.f32 %v1316_v38, %v1316_v38  ;;  %v1321_v51 = vmul.f32 %v1317_v0, %v1317_v0  ;;  %v1322_v52 = vmul.f32 %v1318_v44, %v1318_v44 }
 0x5ed   :  { %2103 = vmatprep.mubr.f32.mxu1 %v1319_v39 }
 0x5ee   :  { %2104 = vmatmul.mubr.f32.vlgmr.msra.gmra.mrb[20].mxu1 %v1320_v41 }
 0x5ef   :  { %2106 = vmatprep.mubr.f32.mxu1 %v1321_v51 }
 0x5f2   :  { %2107 = vmatmul.mubr.f32.gmra.mrb[22].mxu1 %v1322_v52 }
 0x6c1   :  { %v2105_v2 = vpop.f32.mrb[20].mxu1 }
 0x6c2   :  { %v1389_v1 = vpop.f32.mrb[21].mxu1 }
 0x6c3   :  { %v1408_v4 = vadd.f32 %v2105_v2, %v1389_v1 }
 0x6c5   :  { %v2108_v5 = vpop.f32.mrb[22].mxu1 }
 0x6c6   :  { %v1399_v59 = vpop.f32.mrb[23].mxu1 }
 0x6c7   :  { %v1409_v60 = vadd.f32 %v1408_v4, %v1399_v59 }
 0x6c9   :  { %v1410_v61 = vadd.f32 %v2108_v5, %v1409_v60 }
 0x6cb   :  { %v1411_v3 = vrot.slane %v1410_v61, 4 }
 0x6cd   :  { %v1412_v6 = vadd.f32 %v1411_v3, %v1410_v61 }
 0x6cf   :  { %v1413_v7 = vrot.slane %v1412_v6, 2 }
 0x6d1   :  { %v1414_v8 = vadd.f32 %v1413_v7, %v1412_v6 }
 0x6d3   :  { %v1415_v9 = vrot.slane %v1414_v8, 1 }
 0x6d5   :  { %v1416_v10 = vadd.f32 %v1415_v9, %v1414_v8 }
 0x6d7   :  { %v1417_v11 = vmul.f32 0.001953125, %v1416_v10 }
 0x6d9   :  { %v1418_v45 = vadd.f32 1e-05, %v1417_v11 }
 0x6db   :  { %2507 = vrsqrt.f32 %v1418_v45 }
 0x6e5   :  { %v2508_v12 = vpop.eup %2507 }
 0x6e6   :  { %v1420_v47 = vmul.f32 %v2508_v12, %v1315_v63  ;;  %v1421_v48 = vmul.f32 %v2508_v12, %v1316_v38  ;;  %v1422_v50 = vmul.f32 %v2508_v12, %v1317_v0  ;;  %v1423_v13 = vmul.f32 %v2508_v12, %v1318_v44 }
 0x6e8   :  { %v1424_v21 = vadd.f32 %v2509_v14, %v1420_v47  ;;  %v1425_v32 = vadd.f32 %v2510_v27, %v1421_v48  ;;  %v1426_v40 = vadd.f32 %v2511_v36, %v1422_v50  ;;  %v1427_v43 = vadd.f32 %v2512_v15, %v1423_v13 }
 0x6ea   :  { %1428 = vst [vmem:[%s3230_s6] sm:$0xff] %v1424_v21  ;;  %1429 = vst [vmem:[%s3230_s6 + $0x8] sm:$0xff] %v1425_v32 }
 0x6eb   :  { %1430 = vst [vmem:[%s3230_s6 + $0x10] sm:$0xff] %v1426_v40  ;;  %1431 = vst [vmem:[%s3230_s6 + $0x18] sm:$0xff] %v1427_v43 }
 0x6ec   :  { %1436 = vsyncpa [#allocation4], 1 }

</bundles_post_ra>
